<compile_context>
chip_gen: v5e
topology: v5e:2x2
jax: 0.10.0
libtpu: 0.0.40
codegen_flags: <defaults>
</compile_context>

<pallas_src>
import functools

import jax
import jax.numpy as jnp
from jax.experimental import pallas as pl
from jax.experimental.pallas import tpu as pltpu


# ---------------------------------------------------------------------------
# Fused forward kernel: embedding gather + all encoder blocks, VMEM-resident.
# ---------------------------------------------------------------------------
_N_PER_LAYER = 13  # wq, wk, wv, wo, bo, g1, be1, w1, b1, w2, b2, g2, be2


def _user_encoder_kernel(*refs, num_layers, num_heads):
    poi_ref, user_ref, hour_ref, tbl_ref = refs[0:4]
    out_ref = refs[-1]
    f32 = jnp.float32

    # --- Fused 3-way embedding gather: one multi-hot MXU matmul against the
    # block-diagonal combined table -> lane-dense (L, 3E) activation.
    L = poi_ref.shape[0]
    Vtot = tbl_ref.shape[0]
    iota = jax.lax.broadcasted_iota(jnp.int32, (L, Vtot), 1)
    multi_hot = ((iota == poi_ref[...]) | (iota == user_ref[...])
                 | (iota == hour_ref[...])).astype(f32)          # (L, Vtot)
    x = jnp.dot(multi_hot, tbl_ref[...], preferred_element_type=f32)  # (L, D)
    D = x.shape[1]
    inv_scale = 1.0 / (float(D) ** 0.5)   # reference divides by sqrt(embed_size)

    def layer_norm(y, gamma, beta):
        mu = jnp.mean(y, axis=-1, keepdims=True)
        var = jnp.mean(jnp.square(y - mu), axis=-1, keepdims=True)
        return (y - mu) * jax.lax.rsqrt(var + 1e-5) * gamma + beta

    # TODO(synk): nn.Dropout is identity in eval mode; training-mode dropout
    # (RNG masking) is not implemented here.
    for l in range(num_layers):            # static unroll over layers
        base = 4 + l * _N_PER_LAYER
        (wq_ref, wk_ref, wv_ref, wo_ref, bo_ref, g1_ref, be1_ref,
         w1_ref, b1_ref, w2_ref, b2_ref, g2_ref, be2_ref) = (
             refs[base:base + _N_PER_LAYER])

        # Multi-head self-attention; heads statically unrolled. Per-head
        # weights are pre-split host-side (no 48-lane column slices here);
        # the head concat is replaced by MXU accumulation over wo head rows.
        acc = jnp.zeros((L, D), f32)
        for h in range(num_heads):
            qh = jnp.dot(x, wq_ref[h], preferred_element_type=f32)   # (L, Hd)
            kh = jnp.dot(x, wk_ref[h], preferred_element_type=f32)
            vh = jnp.dot(x, wv_ref[h], preferred_element_type=f32)
            # q @ k^T without materializing a transpose.
            e = jax.lax.dot_general(qh, kh, (((1,), (1,)), ((), ())),
                                    preferred_element_type=f32) * inv_scale
            e = e - jnp.max(e, axis=-1, keepdims=True)
            p = jnp.exp(e)
            p = p * pl.reciprocal(jnp.sum(p, axis=-1, keepdims=True),
                                  approx=True)
            oh = jnp.dot(p, vh, preferred_element_type=f32)           # (L, Hd)
            acc = acc + jnp.dot(oh, wo_ref[h], preferred_element_type=f32)
        attn = acc + bo_ref[...]

        x1 = layer_norm(attn + x, g1_ref[...], be1_ref[...])
        hdn = jnp.maximum(
            jnp.dot(x1, w1_ref[...], preferred_element_type=f32) + b1_ref[...],
            0.0)
        ff = jnp.dot(hdn, w2_ref[...], preferred_element_type=f32) + b2_ref[...]
        x = layer_norm(ff + x1, g2_ref[...], be2_ref[...])

    out_ref[...] = x.astype(out_ref.dtype)


# ---------------------------------------------------------------------------
# Host-side parameter preparation (combined table, per-head weight splits).
# ---------------------------------------------------------------------------
def _build_combined_table(emb_p):
    poi, user, hour = emb_p["poi"], emb_p["user"], emb_p["hour"]
    E = poi.shape[1]
    n_poi, n_user, n_hour = poi.shape[0], user.shape[0], hour.shape[0]
    Vtot = n_poi + n_user + n_hour
    tbl = jnp.zeros((Vtot, 3 * E), poi.dtype)
    tbl = tbl.at[:n_poi, 0:E].set(poi)
    tbl = tbl.at[n_poi:n_poi + n_user, E:2 * E].set(user)
    tbl = tbl.at[n_poi + n_user:, 2 * E:3 * E].set(hour)
    return tbl, (0, n_poi, n_poi + n_user)


def _split_heads_in(w, num_heads):
    # (D, D) -> (H, D, Hd): column blocks of the input-projection weights.
    D = w.shape[0]
    Hd = D // num_heads
    return jnp.stack([w[:, h * Hd:(h + 1) * Hd] for h in range(num_heads)], 0)


def _split_heads_out(w, num_heads):
    # (D, D) -> (H, Hd, D): row blocks of the output-projection weights.
    D = w.shape[0]
    Hd = D // num_heads
    return jnp.stack([w[h * Hd:(h + 1) * Hd, :] for h in range(num_heads)], 0)


def user_encoder_forward(params, feature_seq, *, num_heads):
    emb_p = params["embedding"]
    tbl, (off_poi, off_user, off_hour) = _build_combined_table(emb_p)
    L = feature_seq.shape[1]
    D = tbl.shape[1]

    poi_idx = (feature_seq[0].astype(jnp.int32) + off_poi).reshape(L, 1)
    user_idx = (feature_seq[2].astype(jnp.int32) + off_user).reshape(L, 1)
    hour_idx = (feature_seq[3].astype(jnp.int32) + off_hour).reshape(L, 1)

    operands = [poi_idx, user_idx, hour_idx, tbl]
    for lp in params["layers"]:
        operands += [
            _split_heads_in(lp["wq"], num_heads),
            _split_heads_in(lp["wk"], num_heads),
            _split_heads_in(lp["wv"], num_heads),
            _split_heads_out(lp["wo"], num_heads),
            lp["bo"], lp["g1"], lp["be1"],
            lp["w1"], lp["b1"], lp["w2"], lp["b2"],
            lp["g2"], lp["be2"],
        ]

    num_layers = len(params["layers"])
    kernel = functools.partial(_user_encoder_kernel,
                               num_layers=num_layers, num_heads=num_heads)
    # Single un-gridded pallas_call: every operand is a whole-array VMEM ref
    # (total footprint ~1 MB), activations never leave VMEM between layers.
    return pl.pallas_call(
        kernel,
        out_shape=jax.ShapeDtypeStruct((L, D), tbl.dtype),
        compiler_params=pltpu.CompilerParams(vmem_limit_bytes=32 * 1024 * 1024),
    )(*operands)


# ---------------------------------------------------------------------------
# Params + pure-JAX reference.
# ---------------------------------------------------------------------------
def init_params(key, embed_per_feature, vocab_sizes, num_layers,
                forward_expansion):
    D = 3 * embed_per_feature
    ke, kl = jax.random.split(key)

    def make_table(k, n):
        tbl = 0.1 * jax.random.normal(k, (n + 1, embed_per_feature), jnp.float32)
        return tbl.at[n].set(0.0)                    # padding_idx row is zero

    kp, ku, kh = jax.random.split(ke, 3)
    embedding = {"poi": make_table(kp, vocab_sizes["POI"]),
                 "user": make_table(ku, vocab_sizes["user"]),
                 "hour": make_table(kh, vocab_sizes["hour"])}

    F = forward_expansion
    s = 1.0 / (D ** 0.5)
    layers = []
    for k in jax.random.split(kl, num_layers):
        ks = jax.random.split(k, 10)
        layers.append({
            # Linear weights stored as (in, out) so kernels compute x @ W.
            "wq": s * jax.random.normal(ks[0], (D, D), jnp.float32),
            "wk": s * jax.random.normal(ks[1], (D, D), jnp.float32),
            "wv": s * jax.random.normal(ks[2], (D, D), jnp.float32),
            "wo": s * jax.random.normal(ks[3], (D, D), jnp.float32),
            "bo": 0.1 * jax.random.normal(ks[4], (1, D), jnp.float32),
            "g1": 1.0 + 0.1 * jax.random.normal(ks[5], (1, D), jnp.float32),
            "be1": 0.1 * jax.random.normal(ks[6], (1, D), jnp.float32),
            "w1": s * jax.random.normal(ks[7], (D, F * D), jnp.float32),
            "b1": 0.1 * jax.random.normal(ks[8], (1, F * D), jnp.float32),
            "w2": (1.0 / (F * D) ** 0.5)
                  * jax.random.normal(ks[9], (F * D, D), jnp.float32),
            "b2": jnp.zeros((1, D), jnp.float32),
            "g2": jnp.ones((1, D), jnp.float32),
            "be2": jnp.zeros((1, D), jnp.float32),
        })
    return {"embedding": embedding, "layers": layers}


def reference_forward(params, feature_seq, *, num_heads):
    emb_p = params["embedding"]
    x = jnp.concatenate([emb_p["poi"][feature_seq[0]],
                         emb_p["user"][feature_seq[2]],
                         emb_p["hour"][feature_seq[3]]], axis=1)
    L, D = x.shape
    Hd = D // num_heads
    hp = jax.lax.Precision.HIGHEST

    def layer_norm(y, g, b):
        mu = jnp.mean(y, axis=-1, keepdims=True)
        var = jnp.mean(jnp.square(y - mu), axis=-1, keepdims=True)
        return (y - mu) * jax.lax.rsqrt(var + 1e-5) * g + b

    for lp in params["layers"]:
        q = jnp.dot(x, lp["wq"], precision=hp).reshape(L, num_heads, Hd)
        k = jnp.dot(x, lp["wk"], precision=hp).reshape(L, num_heads, Hd)
        v = jnp.dot(x, lp["wv"], precision=hp).reshape(L, num_heads, Hd)
        energy = jnp.einsum("qhd,khd->hqk", q, k, precision=hp) / (D ** 0.5)
        attn = jax.nn.softmax(energy, axis=2)
        o = jnp.einsum("hql,lhd->qhd", attn, v, precision=hp).reshape(L, D)
        o = jnp.dot(o, lp["wo"], precision=hp) + lp["bo"]
        x1 = layer_norm(o + x, lp["g1"], lp["be1"])
        hdn = jnp.maximum(jnp.dot(x1, lp["w1"], precision=hp) + lp["b1"], 0.0)
        ff = jnp.dot(hdn, lp["w2"], precision=hp) + lp["b2"]
        x = layer_norm(ff + x1, lp["g2"], lp["be2"])
    return x


if __name__ == "__main__":
    key = jax.random.PRNGKey(0)
    embed_per_feature = 32                 # encoder embed_size = 3 * 32 = 96
    vocab_sizes = {"POI": 50, "user": 20, "hour": 24}
    num_layers = 2
    num_heads = 2
    forward_expansion = 4
    L = 8                                  # sequence length

    pkey, xkey = jax.random.split(key)
    params = init_params(pkey, embed_per_feature, vocab_sizes, num_layers,
                         forward_expansion)

    k0, k2, k3 = jax.random.split(xkey, 3)
    poi_idx = jax.random.randint(k0, (L,), 0, vocab_sizes["POI"] + 1, dtype=jnp.int32)
    user_idx = jax.random.randint(k2, (L,), 0, vocab_sizes["user"] + 1, dtype=jnp.int32)
    hour_idx = jax.random.randint(k3, (L,), 0, vocab_sizes["hour"] + 1, dtype=jnp.int32)
    # feature_seq mimics the PyTorch input: row 0 = POI ids, row 1 unused,
    # row 2 = user ids, row 3 = hour ids.
    feature_seq = jnp.stack(
        [poi_idx, jnp.zeros((L,), jnp.int32), user_idx, hour_idx], axis=0)

    out = user_encoder_forward(params, feature_seq, num_heads=num_heads)
    out = jax.block_until_ready(out)

    ref = reference_forward(params, feature_seq, num_heads=num_heads)
    assert out.shape == (L, 3 * embed_per_feature), out.shape
    assert jnp.allclose(out, ref, atol=1e-2, rtol=1e-2), (
        float(jnp.max(jnp.abs(out - ref))))
    print("KERNEL_OK")
</pallas_src>

<mosaic_0001>
module attributes {stable_mosaic.version = 11 : i64} {
  func.func @_user_encoder_kernel(%arg0: memref<8x1xi32, #tpu.memory_space<vmem>>, %arg1: memref<8x1xi32, #tpu.memory_space<vmem>>, %arg2: memref<8x1xi32, #tpu.memory_space<vmem>>, %arg3: memref<97x96xf32, #tpu.memory_space<vmem>>, %arg4: memref<2x96x48xf32, #tpu.memory_space<vmem>>, %arg5: memref<2x96x48xf32, #tpu.memory_space<vmem>>, %arg6: memref<2x96x48xf32, #tpu.memory_space<vmem>>, %arg7: memref<2x48x96xf32, #tpu.memory_space<vmem>>, %arg8: memref<1x96xf32, #tpu.memory_space<vmem>>, %arg9: memref<1x96xf32, #tpu.memory_space<vmem>>, %arg10: memref<1x96xf32, #tpu.memory_space<vmem>>, %arg11: memref<96x384xf32, #tpu.memory_space<vmem>>, %arg12: memref<1x384xf32, #tpu.memory_space<vmem>>, %arg13: memref<384x96xf32, #tpu.memory_space<vmem>>, %arg14: memref<1x96xf32, #tpu.memory_space<vmem>>, %arg15: memref<1x96xf32, #tpu.memory_space<vmem>>, %arg16: memref<1x96xf32, #tpu.memory_space<vmem>>, %arg17: memref<2x96x48xf32, #tpu.memory_space<vmem>>, %arg18: memref<2x96x48xf32, #tpu.memory_space<vmem>>, %arg19: memref<2x96x48xf32, #tpu.memory_space<vmem>>, %arg20: memref<2x48x96xf32, #tpu.memory_space<vmem>>, %arg21: memref<1x96xf32, #tpu.memory_space<vmem>>, %arg22: memref<1x96xf32, #tpu.memory_space<vmem>>, %arg23: memref<1x96xf32, #tpu.memory_space<vmem>>, %arg24: memref<96x384xf32, #tpu.memory_space<vmem>>, %arg25: memref<1x384xf32, #tpu.memory_space<vmem>>, %arg26: memref<384x96xf32, #tpu.memory_space<vmem>>, %arg27: memref<1x96xf32, #tpu.memory_space<vmem>>, %arg28: memref<1x96xf32, #tpu.memory_space<vmem>>, %arg29: memref<1x96xf32, #tpu.memory_space<vmem>>, %arg30: memref<8x96xf32, #tpu.memory_space<vmem>>) attributes {dimension_semantics = [], scalar_prefetch = 0 : i64, scratch_operands = 0 : i64, tpu.core_type = #tpu.core_type<tc>} {
    %0 = tpu.iota {dimensions = array<i32: 1>} : vector<8x97xi32>
    %c0 = arith.constant 0 : index
    %c0_0 = arith.constant 0 : index
    %1 = vector.load %arg0[%c0, %c0_0] : memref<8x1xi32, #tpu.memory_space<vmem>>, vector<8x1xi32>
    %2 = vector.broadcast %1 : vector<8x1xi32> to vector<8x97xi32>
    %3 = arith.cmpi eq, %0, %2 : vector<8x97xi32>
    %c0_1 = arith.constant 0 : index
    %c0_2 = arith.constant 0 : index
    %4 = vector.load %arg1[%c0_1, %c0_2] : memref<8x1xi32, #tpu.memory_space<vmem>>, vector<8x1xi32>
    %5 = vector.broadcast %4 : vector<8x1xi32> to vector<8x97xi32>
    %6 = arith.cmpi eq, %0, %5 : vector<8x97xi32>
    %7 = arith.ori %3, %6 : vector<8x97xi1>
    %c0_3 = arith.constant 0 : index
    %c0_4 = arith.constant 0 : index
    %8 = vector.load %arg2[%c0_3, %c0_4] : memref<8x1xi32, #tpu.memory_space<vmem>>, vector<8x1xi32>
    %9 = vector.broadcast %8 : vector<8x1xi32> to vector<8x97xi32>
    %10 = arith.cmpi eq, %0, %9 : vector<8x97xi32>
    %11 = arith.ori %7, %10 : vector<8x97xi1>
    %12 = arith.extui %11 : vector<8x97xi1> to vector<8x97xi32>
    %13 = arith.sitofp %12 : vector<8x97xi32> to vector<8x97xf32>
    %c0_5 = arith.constant 0 : index
    %c0_6 = arith.constant 0 : index
    %14 = vector.load %arg3[%c0_5, %c0_6] : memref<97x96xf32, #tpu.memory_space<vmem>>, vector<97x96xf32>
    %cst = arith.constant dense<0.000000e+00> : vector<8x96xf32>
    %15 = tpu.matmul %13, %14, %cst {dimension_numbers = #tpu.dot_dimension_numbers<[1], [0], [0], [1], [0, 0, 1, 1], [], []>} : vector<8x97xf32>, vector<97x96xf32>, vector<8x96xf32> -> vector<8x96xf32>
    %cst_7 = arith.constant 0.000000e+00 : f32
    %16 = vector.broadcast %cst_7 : f32 to vector<8x96xf32>
    %c0_8 = arith.constant 0 : index
    %c0_9 = arith.constant 0 : index
    %c0_10 = arith.constant 0 : index
    %17 = vector.load %arg4[%c0_8, %c0_9, %c0_10] : memref<2x96x48xf32, #tpu.memory_space<vmem>>, vector<1x96x48xf32>
    %18 = vector.shape_cast %17 : vector<1x96x48xf32> to vector<96x48xf32>
    %cst_11 = arith.constant dense<0.000000e+00> : vector<8x48xf32>
    %19 = tpu.matmul %15, %18, %cst_11 {dimension_numbers = #tpu.dot_dimension_numbers<[1], [0], [0], [1], [0, 0, 1, 1], [], []>} : vector<8x96xf32>, vector<96x48xf32>, vector<8x48xf32> -> vector<8x48xf32>
    %c0_12 = arith.constant 0 : index
    %c0_13 = arith.constant 0 : index
    %c0_14 = arith.constant 0 : index
    %20 = vector.load %arg5[%c0_12, %c0_13, %c0_14] : memref<2x96x48xf32, #tpu.memory_space<vmem>>, vector<1x96x48xf32>
    %21 = vector.shape_cast %20 : vector<1x96x48xf32> to vector<96x48xf32>
    %cst_15 = arith.constant dense<0.000000e+00> : vector<8x48xf32>
    %22 = tpu.matmul %15, %21, %cst_15 {dimension_numbers = #tpu.dot_dimension_numbers<[1], [0], [0], [1], [0, 0, 1, 1], [], []>} : vector<8x96xf32>, vector<96x48xf32>, vector<8x48xf32> -> vector<8x48xf32>
    %c0_16 = arith.constant 0 : index
    %c0_17 = arith.constant 0 : index
    %c0_18 = arith.constant 0 : index
    %23 = vector.load %arg6[%c0_16, %c0_17, %c0_18] : memref<2x96x48xf32, #tpu.memory_space<vmem>>, vector<1x96x48xf32>
    %24 = vector.shape_cast %23 : vector<1x96x48xf32> to vector<96x48xf32>
    %cst_19 = arith.constant dense<0.000000e+00> : vector<8x48xf32>
    %25 = tpu.matmul %15, %24, %cst_19 {dimension_numbers = #tpu.dot_dimension_numbers<[1], [0], [0], [1], [0, 0, 1, 1], [], []>} : vector<8x96xf32>, vector<96x48xf32>, vector<8x48xf32> -> vector<8x48xf32>
    %cst_20 = arith.constant dense<0.000000e+00> : vector<8x8xf32>
    %26 = tpu.matmul %19, %22, %cst_20 {dimension_numbers = #tpu.dot_dimension_numbers<[1], [1], [0], [0], [0, 0, 1, 0], [], []>} : vector<8x48xf32>, vector<8x48xf32>, vector<8x8xf32> -> vector<8x8xf32>
    %cst_21 = arith.constant 0.102062076 : f32
    %27 = vector.broadcast %cst_21 : f32 to vector<8x8xf32>
    %28 = arith.mulf %26, %27 : vector<8x8xf32>
    %cst_22 = arith.constant dense<0xFF800000> : vector<8xf32>
    %29 = vector.multi_reduction <maximumf>, %28, %cst_22 [1] : vector<8x8xf32> to vector<8xf32>
    %30 = vector.shape_cast %29 : vector<8xf32> to vector<8x1xf32>
    %31 = vector.broadcast %30 : vector<8x1xf32> to vector<8x8xf32>
    %32 = arith.subf %28, %31 : vector<8x8xf32>
    %33 = math.exp %32 : vector<8x8xf32>
    %cst_23 = arith.constant dense<0.000000e+00> : vector<8xf32>
    %34 = vector.multi_reduction <add>, %33, %cst_23 [1] : vector<8x8xf32> to vector<8xf32>
    %35 = vector.shape_cast %34 : vector<8xf32> to vector<8x1xf32>
    %36 = tpu.reciprocal %35 {approx = true} : vector<8x1xf32> -> vector<8x1xf32>
    %37 = vector.broadcast %36 : vector<8x1xf32> to vector<8x8xf32>
    %38 = arith.mulf %33, %37 : vector<8x8xf32>
    %cst_24 = arith.constant dense<0.000000e+00> : vector<8x48xf32>
    %39 = tpu.matmul %38, %25, %cst_24 {dimension_numbers = #tpu.dot_dimension_numbers<[1], [0], [0], [1], [0, 0, 1, 1], [], []>} : vector<8x8xf32>, vector<8x48xf32>, vector<8x48xf32> -> vector<8x48xf32>
    %c0_25 = arith.constant 0 : index
    %c0_26 = arith.constant 0 : index
    %c0_27 = arith.constant 0 : index
    %40 = vector.load %arg7[%c0_25, %c0_26, %c0_27] : memref<2x48x96xf32, #tpu.memory_space<vmem>>, vector<1x48x96xf32>
    %41 = vector.shape_cast %40 : vector<1x48x96xf32> to vector<48x96xf32>
    %cst_28 = arith.constant dense<0.000000e+00> : vector<8x96xf32>
    %42 = tpu.matmul %39, %41, %cst_28 {dimension_numbers = #tpu.dot_dimension_numbers<[1], [0], [0], [1], [0, 0, 1, 1], [], []>} : vector<8x48xf32>, vector<48x96xf32>, vector<8x96xf32> -> vector<8x96xf32>
    %43 = arith.addf %16, %42 : vector<8x96xf32>
    %c1 = arith.constant 1 : index
    %c0_29 = arith.constant 0 : index
    %c0_30 = arith.constant 0 : index
    %44 = vector.load %arg4[%c1, %c0_29, %c0_30] : memref<2x96x48xf32, #tpu.memory_space<vmem>>, vector<1x96x48xf32>
    %45 = vector.shape_cast %44 : vector<1x96x48xf32> to vector<96x48xf32>
    %cst_31 = arith.constant dense<0.000000e+00> : vector<8x48xf32>
    %46 = tpu.matmul %15, %45, %cst_31 {dimension_numbers = #tpu.dot_dimension_numbers<[1], [0], [0], [1], [0, 0, 1, 1], [], []>} : vector<8x96xf32>, vector<96x48xf32>, vector<8x48xf32> -> vector<8x48xf32>
    %c1_32 = arith.constant 1 : index
    %c0_33 = arith.constant 0 : index
    %c0_34 = arith.constant 0 : index
    %47 = vector.load %arg5[%c1_32, %c0_33, %c0_34] : memref<2x96x48xf32, #tpu.memory_space<vmem>>, vector<1x96x48xf32>
    %48 = vector.shape_cast %47 : vector<1x96x48xf32> to vector<96x48xf32>
    %cst_35 = arith.constant dense<0.000000e+00> : vector<8x48xf32>
    %49 = tpu.matmul %15, %48, %cst_35 {dimension_numbers = #tpu.dot_dimension_numbers<[1], [0], [0], [1], [0, 0, 1, 1], [], []>} : vector<8x96xf32>, vector<96x48xf32>, vector<8x48xf32> -> vector<8x48xf32>
    %c1_36 = arith.constant 1 : index
    %c0_37 = arith.constant 0 : index
    %c0_38 = arith.constant 0 : index
    %50 = vector.load %arg6[%c1_36, %c0_37, %c0_38] : memref<2x96x48xf32, #tpu.memory_space<vmem>>, vector<1x96x48xf32>
    %51 = vector.shape_cast %50 : vector<1x96x48xf32> to vector<96x48xf32>
    %cst_39 = arith.constant dense<0.000000e+00> : vector<8x48xf32>
    %52 = tpu.matmul %15, %51, %cst_39 {dimension_numbers = #tpu.dot_dimension_numbers<[1], [0], [0], [1], [0, 0, 1, 1], [], []>} : vector<8x96xf32>, vector<96x48xf32>, vector<8x48xf32> -> vector<8x48xf32>
    %cst_40 = arith.constant dense<0.000000e+00> : vector<8x8xf32>
    %53 = tpu.matmul %46, %49, %cst_40 {dimension_numbers = #tpu.dot_dimension_numbers<[1], [1], [0], [0], [0, 0, 1, 0], [], []>} : vector<8x48xf32>, vector<8x48xf32>, vector<8x8xf32> -> vector<8x8xf32>
    %cst_41 = arith.constant 0.102062076 : f32
    %54 = vector.broadcast %cst_41 : f32 to vector<8x8xf32>
    %55 = arith.mulf %53, %54 : vector<8x8xf32>
    %cst_42 = arith.constant dense<0xFF800000> : vector<8xf32>
    %56 = vector.multi_reduction <maximumf>, %55, %cst_42 [1] : vector<8x8xf32> to vector<8xf32>
    %57 = vector.shape_cast %56 : vector<8xf32> to vector<8x1xf32>
    %58 = vector.broadcast %57 : vector<8x1xf32> to vector<8x8xf32>
    %59 = arith.subf %55, %58 : vector<8x8xf32>
    %60 = math.exp %59 : vector<8x8xf32>
    %cst_43 = arith.constant dense<0.000000e+00> : vector<8xf32>
    %61 = vector.multi_reduction <add>, %60, %cst_43 [1] : vector<8x8xf32> to vector<8xf32>
    %62 = vector.shape_cast %61 : vector<8xf32> to vector<8x1xf32>
    %63 = tpu.reciprocal %62 {approx = true} : vector<8x1xf32> -> vector<8x1xf32>
    %64 = vector.broadcast %63 : vector<8x1xf32> to vector<8x8xf32>
    %65 = arith.mulf %60, %64 : vector<8x8xf32>
    %cst_44 = arith.constant dense<0.000000e+00> : vector<8x48xf32>
    %66 = tpu.matmul %65, %52, %cst_44 {dimension_numbers = #tpu.dot_dimension_numbers<[1], [0], [0], [1], [0, 0, 1, 1], [], []>} : vector<8x8xf32>, vector<8x48xf32>, vector<8x48xf32> -> vector<8x48xf32>
    %c1_45 = arith.constant 1 : index
    %c0_46 = arith.constant 0 : index
    %c0_47 = arith.constant 0 : index
    %67 = vector.load %arg7[%c1_45, %c0_46, %c0_47] : memref<2x48x96xf32, #tpu.memory_space<vmem>>, vector<1x48x96xf32>
    %68 = vector.shape_cast %67 : vector<1x48x96xf32> to vector<48x96xf32>
    %cst_48 = arith.constant dense<0.000000e+00> : vector<8x96xf32>
    %69 = tpu.matmul %66, %68, %cst_48 {dimension_numbers = #tpu.dot_dimension_numbers<[1], [0], [0], [1], [0, 0, 1, 1], [], []>} : vector<8x48xf32>, vector<48x96xf32>, vector<8x96xf32> -> vector<8x96xf32>
    %70 = arith.addf %43, %69 : vector<8x96xf32>
    %c0_49 = arith.constant 0 : index
    %c0_50 = arith.constant 0 : index
    %71 = vector.load %arg8[%c0_49, %c0_50] : memref<1x96xf32, #tpu.memory_space<vmem>>, vector<1x96xf32>
    %72 = vector.broadcast %71 : vector<1x96xf32> to vector<8x96xf32>
    %73 = arith.addf %70, %72 : vector<8x96xf32>
    %74 = arith.addf %73, %15 : vector<8x96xf32>
    %c0_51 = arith.constant 0 : index
    %c0_52 = arith.constant 0 : index
    %75 = vector.load %arg9[%c0_51, %c0_52] : memref<1x96xf32, #tpu.memory_space<vmem>>, vector<1x96xf32>
    %c0_53 = arith.constant 0 : index
    %c0_54 = arith.constant 0 : index
    %76 = vector.load %arg10[%c0_53, %c0_54] : memref<1x96xf32, #tpu.memory_space<vmem>>, vector<1x96xf32>
    %cst_55 = arith.constant dense<0.000000e+00> : vector<8xf32>
    %77 = vector.multi_reduction <add>, %74, %cst_55 [1] : vector<8x96xf32> to vector<8xf32>
    %78 = vector.shape_cast %77 : vector<8xf32> to vector<8x1xf32>
    %cst_56 = arith.constant 9.600000e+01 : f32
    %79 = vector.broadcast %cst_56 : f32 to vector<8x1xf32>
    %80 = arith.divf %78, %79 : vector<8x1xf32>
    %81 = vector.broadcast %80 : vector<8x1xf32> to vector<8x96xf32>
    %82 = arith.subf %74, %81 : vector<8x96xf32>
    %83 = arith.mulf %82, %82 : vector<8x96xf32>
    %cst_57 = arith.constant dense<0.000000e+00> : vector<8xf32>
    %84 = vector.multi_reduction <add>, %83, %cst_57 [1] : vector<8x96xf32> to vector<8xf32>
    %85 = vector.shape_cast %84 : vector<8xf32> to vector<8x1xf32>
    %cst_58 = arith.constant 9.600000e+01 : f32
    %86 = vector.broadcast %cst_58 : f32 to vector<8x1xf32>
    %87 = arith.divf %85, %86 : vector<8x1xf32>
    %88 = vector.broadcast %80 : vector<8x1xf32> to vector<8x96xf32>
    %89 = arith.subf %74, %88 : vector<8x96xf32>
    %cst_59 = arith.constant 9.99999974E-6 : f32
    %90 = vector.broadcast %cst_59 : f32 to vector<8x1xf32>
    %91 = arith.addf %87, %90 : vector<8x1xf32>
    %92 = math.rsqrt %91 : vector<8x1xf32>
    %93 = vector.broadcast %92 : vector<8x1xf32> to vector<8x96xf32>
    %94 = arith.mulf %89, %93 : vector<8x96xf32>
    %95 = vector.broadcast %75 : vector<1x96xf32> to vector<8x96xf32>
    %96 = arith.mulf %94, %95 : vector<8x96xf32>
    %97 = vector.broadcast %76 : vector<1x96xf32> to vector<8x96xf32>
    %98 = arith.addf %96, %97 : vector<8x96xf32>
    %c0_60 = arith.constant 0 : index
    %c0_61 = arith.constant 0 : index
    %99 = vector.load %arg11[%c0_60, %c0_61] : memref<96x384xf32, #tpu.memory_space<vmem>>, vector<96x384xf32>
    %cst_62 = arith.constant dense<0.000000e+00> : vector<8x384xf32>
    %100 = tpu.matmul %98, %99, %cst_62 {dimension_numbers = #tpu.dot_dimension_numbers<[1], [0], [0], [1], [0, 0, 1, 1], [], []>} : vector<8x96xf32>, vector<96x384xf32>, vector<8x384xf32> -> vector<8x384xf32>
    %c0_63 = arith.constant 0 : index
    %c0_64 = arith.constant 0 : index
    %101 = vector.load %arg12[%c0_63, %c0_64] : memref<1x384xf32, #tpu.memory_space<vmem>>, vector<1x384xf32>
    %102 = vector.broadcast %101 : vector<1x384xf32> to vector<8x384xf32>
    %103 = arith.addf %100, %102 : vector<8x384xf32>
    %cst_65 = arith.constant 0.000000e+00 : f32
    %104 = vector.broadcast %cst_65 : f32 to vector<8x384xf32>
    %105 = arith.maximumf %103, %104 : vector<8x384xf32>
    %c0_66 = arith.constant 0 : index
    %c0_67 = arith.constant 0 : index
    %106 = vector.load %arg13[%c0_66, %c0_67] : memref<384x96xf32, #tpu.memory_space<vmem>>, vector<384x96xf32>
    %cst_68 = arith.constant dense<0.000000e+00> : vector<8x96xf32>
    %107 = tpu.matmul %105, %106, %cst_68 {dimension_numbers = #tpu.dot_dimension_numbers<[1], [0], [0], [1], [0, 0, 1, 1], [], []>} : vector<8x384xf32>, vector<384x96xf32>, vector<8x96xf32> -> vector<8x96xf32>
    %c0_69 = arith.constant 0 : index
    %c0_70 = arith.constant 0 : index
    %108 = vector.load %arg14[%c0_69, %c0_70] : memref<1x96xf32, #tpu.memory_space<vmem>>, vector<1x96xf32>
    %109 = vector.broadcast %108 : vector<1x96xf32> to vector<8x96xf32>
    %110 = arith.addf %107, %109 : vector<8x96xf32>
    %111 = arith.addf %110, %98 : vector<8x96xf32>
    %c0_71 = arith.constant 0 : index
    %c0_72 = arith.constant 0 : index
    %112 = vector.load %arg15[%c0_71, %c0_72] : memref<1x96xf32, #tpu.memory_space<vmem>>, vector<1x96xf32>
    %c0_73 = arith.constant 0 : index
    %c0_74 = arith.constant 0 : index
    %113 = vector.load %arg16[%c0_73, %c0_74] : memref<1x96xf32, #tpu.memory_space<vmem>>, vector<1x96xf32>
    %cst_75 = arith.constant dense<0.000000e+00> : vector<8xf32>
    %114 = vector.multi_reduction <add>, %111, %cst_75 [1] : vector<8x96xf32> to vector<8xf32>
    %115 = vector.shape_cast %114 : vector<8xf32> to vector<8x1xf32>
    %cst_76 = arith.constant 9.600000e+01 : f32
    %116 = vector.broadcast %cst_76 : f32 to vector<8x1xf32>
    %117 = arith.divf %115, %116 : vector<8x1xf32>
    %118 = vector.broadcast %117 : vector<8x1xf32> to vector<8x96xf32>
    %119 = arith.subf %111, %118 : vector<8x96xf32>
    %120 = arith.mulf %119, %119 : vector<8x96xf32>
    %cst_77 = arith.constant dense<0.000000e+00> : vector<8xf32>
    %121 = vector.multi_reduction <add>, %120, %cst_77 [1] : vector<8x96xf32> to vector<8xf32>
    %122 = vector.shape_cast %121 : vector<8xf32> to vector<8x1xf32>
    %cst_78 = arith.constant 9.600000e+01 : f32
    %123 = vector.broadcast %cst_78 : f32 to vector<8x1xf32>
    %124 = arith.divf %122, %123 : vector<8x1xf32>
    %125 = vector.broadcast %117 : vector<8x1xf32> to vector<8x96xf32>
    %126 = arith.subf %111, %125 : vector<8x96xf32>
    %cst_79 = arith.constant 9.99999974E-6 : f32
    %127 = vector.broadcast %cst_79 : f32 to vector<8x1xf32>
    %128 = arith.addf %124, %127 : vector<8x1xf32>
    %129 = math.rsqrt %128 : vector<8x1xf32>
    %130 = vector.broadcast %129 : vector<8x1xf32> to vector<8x96xf32>
    %131 = arith.mulf %126, %130 : vector<8x96xf32>
    %132 = vector.broadcast %112 : vector<1x96xf32> to vector<8x96xf32>
    %133 = arith.mulf %131, %132 : vector<8x96xf32>
    %134 = vector.broadcast %113 : vector<1x96xf32> to vector<8x96xf32>
    %135 = arith.addf %133, %134 : vector<8x96xf32>
    %cst_80 = arith.constant 0.000000e+00 : f32
    %136 = vector.broadcast %cst_80 : f32 to vector<8x96xf32>
    %c0_81 = arith.constant 0 : index
    %c0_82 = arith.constant 0 : index
    %c0_83 = arith.constant 0 : index
    %137 = vector.load %arg17[%c0_81, %c0_82, %c0_83] : memref<2x96x48xf32, #tpu.memory_space<vmem>>, vector<1x96x48xf32>
    %138 = vector.shape_cast %137 : vector<1x96x48xf32> to vector<96x48xf32>
    %cst_84 = arith.constant dense<0.000000e+00> : vector<8x48xf32>
    %139 = tpu.matmul %135, %138, %cst_84 {dimension_numbers = #tpu.dot_dimension_numbers<[1], [0], [0], [1], [0, 0, 1, 1], [], []>} : vector<8x96xf32>, vector<96x48xf32>, vector<8x48xf32> -> vector<8x48xf32>
    %c0_85 = arith.constant 0 : index
    %c0_86 = arith.constant 0 : index
    %c0_87 = arith.constant 0 : index
    %140 = vector.load %arg18[%c0_85, %c0_86, %c0_87] : memref<2x96x48xf32, #tpu.memory_space<vmem>>, vector<1x96x48xf32>
    %141 = vector.shape_cast %140 : vector<1x96x48xf32> to vector<96x48xf32>
    %cst_88 = arith.constant dense<0.000000e+00> : vector<8x48xf32>
    %142 = tpu.matmul %135, %141, %cst_88 {dimension_numbers = #tpu.dot_dimension_numbers<[1], [0], [0], [1], [0, 0, 1, 1], [], []>} : vector<8x96xf32>, vector<96x48xf32>, vector<8x48xf32> -> vector<8x48xf32>
    %c0_89 = arith.constant 0 : index
    %c0_90 = arith.constant 0 : index
    %c0_91 = arith.constant 0 : index
    %143 = vector.load %arg19[%c0_89, %c0_90, %c0_91] : memref<2x96x48xf32, #tpu.memory_space<vmem>>, vector<1x96x48xf32>
    %144 = vector.shape_cast %143 : vector<1x96x48xf32> to vector<96x48xf32>
    %cst_92 = arith.constant dense<0.000000e+00> : vector<8x48xf32>
    %145 = tpu.matmul %135, %144, %cst_92 {dimension_numbers = #tpu.dot_dimension_numbers<[1], [0], [0], [1], [0, 0, 1, 1], [], []>} : vector<8x96xf32>, vector<96x48xf32>, vector<8x48xf32> -> vector<8x48xf32>
    %cst_93 = arith.constant dense<0.000000e+00> : vector<8x8xf32>
    %146 = tpu.matmul %139, %142, %cst_93 {dimension_numbers = #tpu.dot_dimension_numbers<[1], [1], [0], [0], [0, 0, 1, 0], [], []>} : vector<8x48xf32>, vector<8x48xf32>, vector<8x8xf32> -> vector<8x8xf32>
    %cst_94 = arith.constant 0.102062076 : f32
    %147 = vector.broadcast %cst_94 : f32 to vector<8x8xf32>
    %148 = arith.mulf %146, %147 : vector<8x8xf32>
    %cst_95 = arith.constant dense<0xFF800000> : vector<8xf32>
    %149 = vector.multi_reduction <maximumf>, %148, %cst_95 [1] : vector<8x8xf32> to vector<8xf32>
    %150 = vector.shape_cast %149 : vector<8xf32> to vector<8x1xf32>
    %151 = vector.broadcast %150 : vector<8x1xf32> to vector<8x8xf32>
    %152 = arith.subf %148, %151 : vector<8x8xf32>
    %153 = math.exp %152 : vector<8x8xf32>
    %cst_96 = arith.constant dense<0.000000e+00> : vector<8xf32>
    %154 = vector.multi_reduction <add>, %153, %cst_96 [1] : vector<8x8xf32> to vector<8xf32>
    %155 = vector.shape_cast %154 : vector<8xf32> to vector<8x1xf32>
    %156 = tpu.reciprocal %155 {approx = true} : vector<8x1xf32> -> vector<8x1xf32>
    %157 = vector.broadcast %156 : vector<8x1xf32> to vector<8x8xf32>
    %158 = arith.mulf %153, %157 : vector<8x8xf32>
    %cst_97 = arith.constant dense<0.000000e+00> : vector<8x48xf32>
    %159 = tpu.matmul %158, %145, %cst_97 {dimension_numbers = #tpu.dot_dimension_numbers<[1], [0], [0], [1], [0, 0, 1, 1], [], []>} : vector<8x8xf32>, vector<8x48xf32>, vector<8x48xf32> -> vector<8x48xf32>
    %c0_98 = arith.constant 0 : index
    %c0_99 = arith.constant 0 : index
    %c0_100 = arith.constant 0 : index
    %160 = vector.load %arg20[%c0_98, %c0_99, %c0_100] : memref<2x48x96xf32, #tpu.memory_space<vmem>>, vector<1x48x96xf32>
    %161 = vector.shape_cast %160 : vector<1x48x96xf32> to vector<48x96xf32>
    %cst_101 = arith.constant dense<0.000000e+00> : vector<8x96xf32>
    %162 = tpu.matmul %159, %161, %cst_101 {dimension_numbers = #tpu.dot_dimension_numbers<[1], [0], [0], [1], [0, 0, 1, 1], [], []>} : vector<8x48xf32>, vector<48x96xf32>, vector<8x96xf32> -> vector<8x96xf32>
    %163 = arith.addf %136, %162 : vector<8x96xf32>
    %c1_102 = arith.constant 1 : index
    %c0_103 = arith.constant 0 : index
    %c0_104 = arith.constant 0 : index
    %164 = vector.load %arg17[%c1_102, %c0_103, %c0_104] : memref<2x96x48xf32, #tpu.memory_space<vmem>>, vector<1x96x48xf32>
    %165 = vector.shape_cast %164 : vector<1x96x48xf32> to vector<96x48xf32>
    %cst_105 = arith.constant dense<0.000000e+00> : vector<8x48xf32>
    %166 = tpu.matmul %135, %165, %cst_105 {dimension_numbers = #tpu.dot_dimension_numbers<[1], [0], [0], [1], [0, 0, 1, 1], [], []>} : vector<8x96xf32>, vector<96x48xf32>, vector<8x48xf32> -> vector<8x48xf32>
    %c1_106 = arith.constant 1 : index
    %c0_107 = arith.constant 0 : index
    %c0_108 = arith.constant 0 : index
    %167 = vector.load %arg18[%c1_106, %c0_107, %c0_108] : memref<2x96x48xf32, #tpu.memory_space<vmem>>, vector<1x96x48xf32>
    %168 = vector.shape_cast %167 : vector<1x96x48xf32> to vector<96x48xf32>
    %cst_109 = arith.constant dense<0.000000e+00> : vector<8x48xf32>
    %169 = tpu.matmul %135, %168, %cst_109 {dimension_numbers = #tpu.dot_dimension_numbers<[1], [0], [0], [1], [0, 0, 1, 1], [], []>} : vector<8x96xf32>, vector<96x48xf32>, vector<8x48xf32> -> vector<8x48xf32>
    %c1_110 = arith.constant 1 : index
    %c0_111 = arith.constant 0 : index
    %c0_112 = arith.constant 0 : index
    %170 = vector.load %arg19[%c1_110, %c0_111, %c0_112] : memref<2x96x48xf32, #tpu.memory_space<vmem>>, vector<1x96x48xf32>
    %171 = vector.shape_cast %170 : vector<1x96x48xf32> to vector<96x48xf32>
    %cst_113 = arith.constant dense<0.000000e+00> : vector<8x48xf32>
    %172 = tpu.matmul %135, %171, %cst_113 {dimension_numbers = #tpu.dot_dimension_numbers<[1], [0], [0], [1], [0, 0, 1, 1], [], []>} : vector<8x96xf32>, vector<96x48xf32>, vector<8x48xf32> -> vector<8x48xf32>
    %cst_114 = arith.constant dense<0.000000e+00> : vector<8x8xf32>
    %173 = tpu.matmul %166, %169, %cst_114 {dimension_numbers = #tpu.dot_dimension_numbers<[1], [1], [0], [0], [0, 0, 1, 0], [], []>} : vector<8x48xf32>, vector<8x48xf32>, vector<8x8xf32> -> vector<8x8xf32>
    %cst_115 = arith.constant 0.102062076 : f32
    %174 = vector.broadcast %cst_115 : f32 to vector<8x8xf32>
    %175 = arith.mulf %173, %174 : vector<8x8xf32>
    %cst_116 = arith.constant dense<0xFF800000> : vector<8xf32>
    %176 = vector.multi_reduction <maximumf>, %175, %cst_116 [1] : vector<8x8xf32> to vector<8xf32>
    %177 = vector.shape_cast %176 : vector<8xf32> to vector<8x1xf32>
    %178 = vector.broadcast %177 : vector<8x1xf32> to vector<8x8xf32>
    %179 = arith.subf %175, %178 : vector<8x8xf32>
    %180 = math.exp %179 : vector<8x8xf32>
    %cst_117 = arith.constant dense<0.000000e+00> : vector<8xf32>
    %181 = vector.multi_reduction <add>, %180, %cst_117 [1] : vector<8x8xf32> to vector<8xf32>
    %182 = vector.shape_cast %181 : vector<8xf32> to vector<8x1xf32>
    %183 = tpu.reciprocal %182 {approx = true} : vector<8x1xf32> -> vector<8x1xf32>
    %184 = vector.broadcast %183 : vector<8x1xf32> to vector<8x8xf32>
    %185 = arith.mulf %180, %184 : vector<8x8xf32>
    %cst_118 = arith.constant dense<0.000000e+00> : vector<8x48xf32>
    %186 = tpu.matmul %185, %172, %cst_118 {dimension_numbers = #tpu.dot_dimension_numbers<[1], [0], [0], [1], [0, 0, 1, 1], [], []>} : vector<8x8xf32>, vector<8x48xf32>, vector<8x48xf32> -> vector<8x48xf32>
    %c1_119 = arith.constant 1 : index
    %c0_120 = arith.constant 0 : index
    %c0_121 = arith.constant 0 : index
    %187 = vector.load %arg20[%c1_119, %c0_120, %c0_121] : memref<2x48x96xf32, #tpu.memory_space<vmem>>, vector<1x48x96xf32>
    %188 = vector.shape_cast %187 : vector<1x48x96xf32> to vector<48x96xf32>
    %cst_122 = arith.constant dense<0.000000e+00> : vector<8x96xf32>
    %189 = tpu.matmul %186, %188, %cst_122 {dimension_numbers = #tpu.dot_dimension_numbers<[1], [0], [0], [1], [0, 0, 1, 1], [], []>} : vector<8x48xf32>, vector<48x96xf32>, vector<8x96xf32> -> vector<8x96xf32>
    %190 = arith.addf %163, %189 : vector<8x96xf32>
    %c0_123 = arith.constant 0 : index
    %c0_124 = arith.constant 0 : index
    %191 = vector.load %arg21[%c0_123, %c0_124] : memref<1x96xf32, #tpu.memory_space<vmem>>, vector<1x96xf32>
    %192 = vector.broadcast %191 : vector<1x96xf32> to vector<8x96xf32>
    %193 = arith.addf %190, %192 : vector<8x96xf32>
    %194 = arith.addf %193, %135 : vector<8x96xf32>
    %c0_125 = arith.constant 0 : index
    %c0_126 = arith.constant 0 : index
    %195 = vector.load %arg22[%c0_125, %c0_126] : memref<1x96xf32, #tpu.memory_space<vmem>>, vector<1x96xf32>
    %c0_127 = arith.constant 0 : index
    %c0_128 = arith.constant 0 : index
    %196 = vector.load %arg23[%c0_127, %c0_128] : memref<1x96xf32, #tpu.memory_space<vmem>>, vector<1x96xf32>
    %cst_129 = arith.constant dense<0.000000e+00> : vector<8xf32>
    %197 = vector.multi_reduction <add>, %194, %cst_129 [1] : vector<8x96xf32> to vector<8xf32>
    %198 = vector.shape_cast %197 : vector<8xf32> to vector<8x1xf32>
    %cst_130 = arith.constant 9.600000e+01 : f32
    %199 = vector.broadcast %cst_130 : f32 to vector<8x1xf32>
    %200 = arith.divf %198, %199 : vector<8x1xf32>
    %201 = vector.broadcast %200 : vector<8x1xf32> to vector<8x96xf32>
    %202 = arith.subf %194, %201 : vector<8x96xf32>
    %203 = arith.mulf %202, %202 : vector<8x96xf32>
    %cst_131 = arith.constant dense<0.000000e+00> : vector<8xf32>
    %204 = vector.multi_reduction <add>, %203, %cst_131 [1] : vector<8x96xf32> to vector<8xf32>
    %205 = vector.shape_cast %204 : vector<8xf32> to vector<8x1xf32>
    %cst_132 = arith.constant 9.600000e+01 : f32
    %206 = vector.broadcast %cst_132 : f32 to vector<8x1xf32>
    %207 = arith.divf %205, %206 : vector<8x1xf32>
    %208 = vector.broadcast %200 : vector<8x1xf32> to vector<8x96xf32>
    %209 = arith.subf %194, %208 : vector<8x96xf32>
    %cst_133 = arith.constant 9.99999974E-6 : f32
    %210 = vector.broadcast %cst_133 : f32 to vector<8x1xf32>
    %211 = arith.addf %207, %210 : vector<8x1xf32>
    %212 = math.rsqrt %211 : vector<8x1xf32>
    %213 = vector.broadcast %212 : vector<8x1xf32> to vector<8x96xf32>
    %214 = arith.mulf %209, %213 : vector<8x96xf32>
    %215 = vector.broadcast %195 : vector<1x96xf32> to vector<8x96xf32>
    %216 = arith.mulf %214, %215 : vector<8x96xf32>
    %217 = vector.broadcast %196 : vector<1x96xf32> to vector<8x96xf32>
    %218 = arith.addf %216, %217 : vector<8x96xf32>
    %c0_134 = arith.constant 0 : index
    %c0_135 = arith.constant 0 : index
    %219 = vector.load %arg24[%c0_134, %c0_135] : memref<96x384xf32, #tpu.memory_space<vmem>>, vector<96x384xf32>
    %cst_136 = arith.constant dense<0.000000e+00> : vector<8x384xf32>
    %220 = tpu.matmul %218, %219, %cst_136 {dimension_numbers = #tpu.dot_dimension_numbers<[1], [0], [0], [1], [0, 0, 1, 1], [], []>} : vector<8x96xf32>, vector<96x384xf32>, vector<8x384xf32> -> vector<8x384xf32>
    %c0_137 = arith.constant 0 : index
    %c0_138 = arith.constant 0 : index
    %221 = vector.load %arg25[%c0_137, %c0_138] : memref<1x384xf32, #tpu.memory_space<vmem>>, vector<1x384xf32>
    %222 = vector.broadcast %221 : vector<1x384xf32> to vector<8x384xf32>
    %223 = arith.addf %220, %222 : vector<8x384xf32>
    %cst_139 = arith.constant 0.000000e+00 : f32
    %224 = vector.broadcast %cst_139 : f32 to vector<8x384xf32>
    %225 = arith.maximumf %223, %224 : vector<8x384xf32>
    %c0_140 = arith.constant 0 : index
    %c0_141 = arith.constant 0 : index
    %226 = vector.load %arg26[%c0_140, %c0_141] : memref<384x96xf32, #tpu.memory_space<vmem>>, vector<384x96xf32>
    %cst_142 = arith.constant dense<0.000000e+00> : vector<8x96xf32>
    %227 = tpu.matmul %225, %226, %cst_142 {dimension_numbers = #tpu.dot_dimension_numbers<[1], [0], [0], [1], [0, 0, 1, 1], [], []>} : vector<8x384xf32>, vector<384x96xf32>, vector<8x96xf32> -> vector<8x96xf32>
    %c0_143 = arith.constant 0 : index
    %c0_144 = arith.constant 0 : index
    %228 = vector.load %arg27[%c0_143, %c0_144] : memref<1x96xf32, #tpu.memory_space<vmem>>, vector<1x96xf32>
    %229 = vector.broadcast %228 : vector<1x96xf32> to vector<8x96xf32>
    %230 = arith.addf %227, %229 : vector<8x96xf32>
    %231 = arith.addf %230, %218 : vector<8x96xf32>
    %c0_145 = arith.constant 0 : index
    %c0_146 = arith.constant 0 : index
    %232 = vector.load %arg28[%c0_145, %c0_146] : memref<1x96xf32, #tpu.memory_space<vmem>>, vector<1x96xf32>
    %c0_147 = arith.constant 0 : index
    %c0_148 = arith.constant 0 : index
    %233 = vector.load %arg29[%c0_147, %c0_148] : memref<1x96xf32, #tpu.memory_space<vmem>>, vector<1x96xf32>
    %cst_149 = arith.constant dense<0.000000e+00> : vector<8xf32>
    %234 = vector.multi_reduction <add>, %231, %cst_149 [1] : vector<8x96xf32> to vector<8xf32>
    %235 = vector.shape_cast %234 : vector<8xf32> to vector<8x1xf32>
    %cst_150 = arith.constant 9.600000e+01 : f32
    %236 = vector.broadcast %cst_150 : f32 to vector<8x1xf32>
    %237 = arith.divf %235, %236 : vector<8x1xf32>
    %238 = vector.broadcast %237 : vector<8x1xf32> to vector<8x96xf32>
    %239 = arith.subf %231, %238 : vector<8x96xf32>
    %240 = arith.mulf %239, %239 : vector<8x96xf32>
    %cst_151 = arith.constant dense<0.000000e+00> : vector<8xf32>
    %241 = vector.multi_reduction <add>, %240, %cst_151 [1] : vector<8x96xf32> to vector<8xf32>
    %242 = vector.shape_cast %241 : vector<8xf32> to vector<8x1xf32>
    %cst_152 = arith.constant 9.600000e+01 : f32
    %243 = vector.broadcast %cst_152 : f32 to vector<8x1xf32>
    %244 = arith.divf %242, %243 : vector<8x1xf32>
    %245 = vector.broadcast %237 : vector<8x1xf32> to vector<8x96xf32>
    %246 = arith.subf %231, %245 : vector<8x96xf32>
    %cst_153 = arith.constant 9.99999974E-6 : f32
    %247 = vector.broadcast %cst_153 : f32 to vector<8x1xf32>
    %248 = arith.addf %244, %247 : vector<8x1xf32>
    %249 = math.rsqrt %248 : vector<8x1xf32>
    %250 = vector.broadcast %249 : vector<8x1xf32> to vector<8x96xf32>
    %251 = arith.mulf %246, %250 : vector<8x96xf32>
    %252 = vector.broadcast %232 : vector<1x96xf32> to vector<8x96xf32>
    %253 = arith.mulf %251, %252 : vector<8x96xf32>
    %254 = vector.broadcast %233 : vector<1x96xf32> to vector<8x96xf32>
    %255 = arith.addf %253, %254 : vector<8x96xf32>
    %c0_154 = arith.constant 0 : index
    %c0_155 = arith.constant 0 : index
    %256 = vector.load %arg30[%c0_154, %c0_155] : memref<8x96xf32, #tpu.memory_space<vmem>>, vector<8x96xf32>
    tpu.vector_store %arg30[%c0_154, %c0_155], %255 {strides = array<i32>} : memref<8x96xf32, #tpu.memory_space<vmem>>, vector<8x96xf32>,
    return
  }
}

</mosaic_0001>

<bundles_post_ra>
// kernel: tpu_custom_call.1
= control target key start
LH: loop header
LB: loop body
LE: loop exit
PB: predicated region body
PF: predicated region fallthrough
CT: control target
= control target key end

     0   :  { %s1811_s6 = smov 1   ;;  %s1812_s10 = smov 2   ;;  %s2478_s0 = inlined_call_operand.smem [shape: u32[31], index: -1, kind: input, shape index: {}] }
   0x1   :  { %s1853_s5 = sld [smem:[%s2478_s0]]   ;;  %s1813_s14 = smov 3  }
   0x2   :  { %s1858_s9 = sld [smem:[%s2478_s0 + %s1811_s6]]   ;;  %s1814_s18 = smov 4  }
   0x3   :  { %s1863_s13 = sld [smem:[%s2478_s0 + %s1812_s10]]   ;;  %s1815_s22 = smov 5  }
   0x4   :  { %s1868_s17 = sld [smem:[%s2478_s0 + %s1813_s14]]   ;;  %s1816_s26 = smov 6  }
   0x5   :  { %s1873_s21 = sld [smem:[%s2478_s0 + %s1814_s18]]   ;;  %s1817_s30 = smov 7  }
   0x6   :  { %s1878_s25 = sld [smem:[%s2478_s0 + %s1815_s22]]   ;;  %s1818_s4 = smov 8  }
   0x7   :  { %s1883_s29 = sld [smem:[%s2478_s0 + %s1816_s26]]   ;;  %s1819_s10 = smov 9  }
   0x8   :  { %s1888_s3 = sld [smem:[%s2478_s0 + %s1817_s30]]   ;;  %s1820_s15 = smov 10  }
   0x9   :  { %s1893_s8 = sld [smem:[%s2478_s0 + %s1818_s4]]   ;;  %s1821_s20 = smov 11  }
   0xa   :  { %s1898_s14 = sld [smem:[%s2478_s0 + %s1819_s10]]   ;;  %s1822_s26 = smov 12  }
   0xb   :  { %s1903_s19 = sld [smem:[%s2478_s0 + %s1820_s15]]   ;;  %s1823_s1 = smov 13  }
   0xc   :  { %s1908_s24 = sld [smem:[%s2478_s0 + %s1821_s20]]   ;;  %s1824_s7 = smov 14  }
   0xd   :  { %s1913_s30 = sld [smem:[%s2478_s0 + %s1822_s26]]   ;;  %s1825_s15 = smov 15  }
   0xe   :  { %s1918_s6 = sld [smem:[%s2478_s0 + %s1823_s1]]   ;;  %s1826_s22 = smov 16  }
   0xf   :  { %s1923_s12 = sld [smem:[%s2478_s0 + %s1824_s7]]   ;;  %s1827_s28 = smov 17  }
  0x10   :  { %s1928_s20 = sld [smem:[%s2478_s0 + %s1825_s15]]   ;;  %s1828_s7 = smov 18  }
  0x11   :  { %s1933_s27 = sld [smem:[%s2478_s0 + %s1826_s22]]   ;;  %s1829_s15 = smov 19  }
  0x12   :  { %s1938_s4 = sld [smem:[%s2478_s0 + %s1827_s28]]   ;;  %s1830_s22 = smov 20  }
  0x13   :  { %s1831_s28 = smov 21  }
  0x15   :  { %2485 = sst [smem:[#allocation5_spill]] %s1923_s12 }
  0x16   :  { %2486 = sst [smem:[#allocation6_spill]] %s1928_s20 }
  0x17   :  { %2487 = sst [smem:[#allocation7_spill]] %s1933_s27 }
  0x18   :  { %2488 = sst [smem:[#allocation8_spill]] %s1938_s4 }
  0x19   :  { %s1943_s12 = sld [smem:[%s2478_s0 + %s1828_s7]]   ;;  %s1832_s7 = smov 22  }
  0x1a   :  { %s1948_s20 = sld [smem:[%s2478_s0 + %s1829_s15]]   ;;  %s1833_s15 = smov 23  }
  0x1b   :  { %s1953_s27 = sld [smem:[%s2478_s0 + %s1830_s22]]   ;;  %s1834_s22 = smov 24  }
  0x1c   :  { %s1958_s4 = sld [smem:[%s2478_s0 + %s1831_s28]]   ;;  %s1835_s28 = smov 25  }
  0x1f   :  { %2489 = sst [smem:[#allocation9_spill]] %s1943_s12 }
  0x20   :  { %2490 = sst [smem:[#allocation10_spill]] %s1948_s20 }
  0x21   :  { %2491 = sst [smem:[#allocation11_spill]] %s1953_s27 }
  0x22   :  { %2492 = sst [smem:[#allocation12_spill]] %s1958_s4 }
  0x23   :  { %s1963_s12 = sld [smem:[%s2478_s0 + %s1832_s7]]   ;;  %s1836_s7 = smov 26  }
  0x24   :  { %s1968_s20 = sld [smem:[%s2478_s0 + %s1833_s15]]   ;;  %s1837_s15 = smov 27  }
  0x25   :  { %s1973_s27 = sld [smem:[%s2478_s0 + %s1834_s22]]   ;;  %s1838_s22 = smov 28  }
  0x26   :  { %s1978_s4 = sld [smem:[%s2478_s0 + %s1835_s28]]   ;;  %s1839_s28 = smov 29  }
  0x29   :  { %2493 = sst [smem:[#allocation13_spill]] %s1963_s12 }
  0x2a   :  { %2494 = sst [smem:[#allocation14_spill]] %s1968_s20 }
  0x2b   :  { %2495 = sst [smem:[#allocation15_spill]] %s1973_s27 }
  0x2c   :  { %2496 = sst [smem:[#allocation16_spill]] %s1978_s4 }
  0x2d   :  { %s1983_s12 = sld [smem:[%s2478_s0 + %s1836_s7]]   ;;  %s1840_s7 = smov 30  }
  0x2e   :  { %s1988_s20 = sld [smem:[%s2478_s0 + %s1837_s15]]  }
  0x2f   :  { %s1993_s27 = sld [smem:[%s2478_s0 + %s1838_s22]]  }
  0x30   :  { %s1998_s4 = sld [smem:[%s2478_s0 + %s1839_s28]]  }
  0x33   :  { %2497 = sst [smem:[#allocation17_spill]] %s1983_s12 }
  0x34   :  { %s2003_s12 = sld [smem:[%s2478_s0 + %s1840_s7]]  }
  0x35   :  { %v129_v0 = vld [vmem:[%s1853_s5] sm:$0xff]  ;;  %vm165_vm0 = vcmask 1040384   ;;  %v1841_v2 = vmov 0   ;;  %v159_v4 = vld [vmem:[%s1868_s17 + $0x58] sm:$0xff]  ;;  %v158_v5 = vld [vmem:[%s1868_s17 + $0x50] sm:$0xff] }
  0x36   :  { %v140_v1 = vld [vmem:[%s1863_s13] sm:$0xff]  ;;  %1745 = vset.pattern.permute.xlu0 %v1841_v2  ;;  %1746 = vset.pattern.permute.xlu1 %v1841_v2  ;;  %v157_v6 = vld [vmem:[%s1868_s17 + $0x48] sm:$0xff] }
  0x37   :  { %v160_v3 = vld [vmem:[%s1868_s17 + $0x60] sm:$0x1]  ;;  %131 = vperm.xlu0 %1745, %v129_v0   ;;  %142 = vperm.xlu1 %1746, %v140_v1  }
  0x38   :  { %1591 = vmatpush.msk.msra.mxu0 %vm165_vm0, %v160_v3 }
  0x3a   :  { %173 = vmatpush.msra.mxu0 %v159_v4 }
  0x3b   :  { %66 = vsyncpa [#allocation3], 0  ;;  %v134_v7 = vld [vmem:[%s1858_s9] sm:$0xff]  ;;  %v155_v9 = vld [vmem:[%s1868_s17 + $0x38] sm:$0xff]  ;;  %v127_v58 = vlaneseq  ;;  %vm161_vm5 = vcmask 793600   ;;  %vm201_vm7 = vcmask 785408  }
  0x3c   :  { %174 = vmatpush.msra.mxu0 %v158_v5  ;;  %v156_v8 = vld [vmem:[%s1868_s17 + $0x40] sm:$0xff]  ;;  %v154_v10 = vld [vmem:[%s1868_s17 + $0x30] sm:$0xff]  ;;  %v153_v11 = vld [vmem:[%s1868_s17 + $0x28] sm:$0xff]  ;;  %vm289_vm8 = vcmask 392192   ;;  %vm317_vm9 = vcmask 64512   ;;  %s2498_s0 = sld [smem:[#allocation5_spill]] }
  0x3d   :  { %v152_v12 = vld [vmem:[%s1868_s17 + $0x20] sm:$0xff]  ;;  %v151_v13 = vld [vmem:[%s1868_s17 + $0x18] sm:$0xff]  ;;  %v150_v14 = vld [vmem:[%s1868_s17 + $0x10] sm:$0xff]  ;;  %v128_v3 = vand.u32 127, %v127_v58  ;;  %s2499_s5 = sld [smem:[#allocation9_spill]]  ;;  %s1801_s18 = scalar_lea.hbm %s2003_s12, 8 }
  0x3e   :  { %175 = vmatpush.msra.mxu0 %v157_v6  ;;  %v149_v15 = vld [vmem:[%s1868_s17 + $0x8] sm:$0xff]  ;;  %v148_v16 = vld [vmem:[%s1868_s17] sm:$0xff]  ;;  %v200_v17 = vld [vmem:[%s1873_s21 + $0x58] sm:$0xff]  ;;  %s2500_s9 = sld [smem:[#allocation8_spill]] }
  0x3f   :  { %136 = vperm.xlu0 %1745, %v134_v7   ;;  %v268_v18 = vld [vmem:[%s1883_s29 + $0x58] sm:$0xff]  ;;  %v199_v19 = vld [vmem:[%s1873_s21 + $0x50] sm:$0xff]  ;;  %209 = vmatpush.msra.mxu1 %v200_v17  ;;  %v198_v21 = vld [vmem:[%s1873_s21 + $0x48] sm:$0xff]  ;;  %s2501_s13 = sld [smem:[#allocation10_spill]] }
  0x40   :  { %176 = vmatpush.msra.mxu0 %v156_v8  ;;  %273 = vmatpush.msra.mxu3 %v268_v18  ;;  %v267_v20 = vld [vmem:[%s1883_s29 + $0x50] sm:$0xff]  ;;  %v266_v22 = vld [vmem:[%s1883_s29 + $0x48] sm:$0xff]  ;;  %v197_v23 = vld [vmem:[%s1873_s21 + $0x40] sm:$0xff]  ;;  %s2502_s17 = sld [smem:[#allocation6_spill]] }
  0x41   :  { %210 = vmatpush.msra.mxu1 %v199_v19  ;;  %v265_v24 = vld [vmem:[%s1883_s29 + $0x40] sm:$0xff]  ;;  %v236_v25 = vld [vmem:[%s1878_s25 + $0x58] sm:$0xff]  ;;  %v235_v29 = vld [vmem:[%s1878_s25 + $0x50] sm:$0xff] }
  0x42   :  { %177 = vmatpush.msra.mxu0 %v155_v9  ;;  %274 = vmatpush.msra.mxu3 %v267_v20  ;;  %v1623_v26 = vld [vmem:[%s1878_s25 + $0xb8] sm:$0xff]  ;;  %v195_v30 = vld [vmem:[%s1873_s21 + $0x30] sm:$0xff]  ;;  %v234_v33 = vld [vmem:[%s1878_s25 + $0x48] sm:$0xff] }
  0x43   :  { %211 = vmatpush.msra.mxu1 %v198_v21  ;;  %v196_v27 = vld [vmem:[%s1873_s21 + $0x38] sm:$0xff]  ;;  %241 = vmatpush.msra.mxu2 %v236_v25  ;;  %v1622_v31 = vld [vmem:[%s1878_s25 + $0xb0] sm:$0xff]  ;;  %v1621_v34 = vld [vmem:[%s1878_s25 + $0xa8] sm:$0xff] }
  0x44   :  { %178 = vmatpush.msra.mxu0 %v154_v10  ;;  %275 = vmatpush.msra.mxu3 %v266_v22  ;;  %v264_v28 = vld [vmem:[%s1883_s29 + $0x38] sm:$0xff]  ;;  %v263_v32 = vld [vmem:[%s1883_s29 + $0x30] sm:$0xff]  ;;  %v233_v35 = vld [vmem:[%s1878_s25 + $0x40] sm:$0xff] }
  0x45   :  { %212 = vmatpush.msra.mxu1 %v197_v23  ;;  %242 = vmatpush.msra.mxu2 %v235_v29  ;;  %v1620_v36 = vld [vmem:[%s1878_s25 + $0xa0] sm:$0xff]  ;;  %v194_v37 = vld [vmem:[%s1873_s21 + $0x28] sm:$0xff]  ;;  %v232_v39 = vld [vmem:[%s1878_s25 + $0x38] sm:$0xff] }
  0x46   :  { %179 = vmatpush.msra.mxu0 %v153_v11  ;;  %276 = vmatpush.msra.mxu3 %v265_v24  ;;  %v262_v38 = vld [vmem:[%s1883_s29 + $0x28] sm:$0xff]  ;;  %v1619_v40 = vld [vmem:[%s1878_s25 + $0x98] sm:$0xff]  ;;  %v193_v41 = vld [vmem:[%s1873_s21 + $0x20] sm:$0xff] }
  0x47   :  { %213 = vmatpush.msra.mxu1 %v196_v27  ;;  %243 = vmatpush.msra.mxu2 %v234_v33  ;;  %v261_v42 = vld [vmem:[%s1883_s29 + $0x20] sm:$0xff]  ;;  %v231_v43 = vld [vmem:[%s1878_s25 + $0x30] sm:$0xff]  ;;  %v192_v45 = vld [vmem:[%s1873_s21 + $0x18] sm:$0xff] }
  0x48   :  { %180 = vmatpush.msra.mxu0 %v152_v12  ;;  %277 = vmatpush.msra.mxu3 %v264_v28  ;;  %v1618_v44 = vld [vmem:[%s1878_s25 + $0x90] sm:$0xff]  ;;  %v260_v46 = vld [vmem:[%s1883_s29 + $0x18] sm:$0xff]  ;;  %v230_v47 = vld [vmem:[%s1878_s25 + $0x28] sm:$0xff] }
  0x49   :  { %214 = vmatpush.msra.mxu1 %v195_v30  ;;  %244 = vmatpush.msra.mxu2 %v233_v35  ;;  %v1617_v48 = vld [vmem:[%s1878_s25 + $0x88] sm:$0xff]  ;;  %v191_v49 = vld [vmem:[%s1873_s21 + $0x10] sm:$0xff]  ;;  %v229_v51 = vld [vmem:[%s1878_s25 + $0x20] sm:$0xff] }
  0x4a   :  { %181 = vmatpush.msra.mxu0 %v151_v13  ;;  %278 = vmatpush.msra.mxu3 %v263_v32  ;;  %v259_v50 = vld [vmem:[%s1883_s29 + $0x10] sm:$0xff]  ;;  %v1616_v52 = vld [vmem:[%s1878_s25 + $0x80] sm:$0xff]  ;;  %v190_v53 = vld [vmem:[%s1873_s21 + $0x8] sm:$0xff] }
  0x4b   :  { %215 = vmatpush.msra.mxu1 %v194_v37  ;;  %245 = vmatpush.msra.mxu2 %v232_v39  ;;  %v258_v54 = vld [vmem:[%s1883_s29 + $0x8] sm:$0xff]  ;;  %v228_v56 = vld [vmem:[%s1878_s25 + $0x18] sm:$0xff]  ;;  %v189_v59 = vld [vmem:[%s1873_s21] sm:$0xff] }
  0x4c   :  { %182 = vmatpush.msra.mxu0 %v150_v14  ;;  %279 = vmatpush.msra.mxu3 %v262_v38  ;;  %v1615_v57 = vld [vmem:[%s1878_s25 + $0x78] sm:$0xff]  ;;  %v257_v60 = vld [vmem:[%s1883_s29] sm:$0xff]  ;;  %v227_v63 = vld [vmem:[%s1878_s25 + $0x10] sm:$0xff]  ;;  %v1842_v14 = vmov 0.0  }
  0x4d   :  { %216 = vmatpush.msra.mxu1 %v193_v41  ;;  %246 = vmatpush.msra.mxu2 %v231_v43  ;;  %v1610_v61 = vld [vmem:[%s1873_s21 + $0xb8] sm:$0xff]  ;;  %v1614_v0 = vld [vmem:[%s1878_s25 + $0x70] sm:$0xff]  ;;  %v226_v5 = vld [vmem:[%s1878_s25 + $0x8] sm:$0xff] }
  0x4e   :  { %183 = vmatpush.msra.mxu0 %v149_v15  ;;  %280 = vmatpush.msra.mxu3 %v261_v42  ;;  %v1636_v62 = vld [vmem:[%s1883_s29 + $0xb8] sm:$0xff]  ;;  %v1609_v1 = vld [vmem:[%s1873_s21 + $0xb0] sm:$0xff]  ;;  %v1613_v6 = vld [vmem:[%s1878_s25 + $0x68] sm:$0xff] }
  0x4f   :  { %217 = vmatpush.msra.mxu1 %v192_v45  ;;  %247 = vmatpush.msra.mxu2 %v230_v47  ;;  %v1635_v2 = vld [vmem:[%s1883_s29 + $0xb0] sm:$0xff]  ;;  %v1608_v7 = vld [vmem:[%s1873_s21 + $0xa8] sm:$0xff]  ;;  %v1607_v10 = vld [vmem:[%s1873_s21 + $0xa0] sm:$0xff] }
  0x50   :  { %184 = vmatpush.msra.mxu0 %v148_v16  ;;  %281 = vmatpush.msra.mxu3 %v260_v46  ;;  %v1634_v8 = vld [vmem:[%s1883_s29 + $0xa8] sm:$0xff]  ;;  %v1633_v11 = vld [vmem:[%s1883_s29 + $0xa0] sm:$0xff]  ;;  %v1606_v12 = vld [vmem:[%s1873_s21 + $0x98] sm:$0xff] }
  0x51   :  { %218 = vmatpush.msra.mxu1 %v191_v49  ;;  %248 = vmatpush.msra.mxu2 %v229_v51  ;;  %v1632_v13 = vld [vmem:[%s1883_s29 + $0x98] sm:$0xff]  ;;  %v1605_v16 = vld [vmem:[%s1873_s21 + $0x90] sm:$0xff]  ;;  %v1604_v18 = vld [vmem:[%s1873_s21 + $0x88] sm:$0xff] }
  0x52   :  { %408 = vmatpush.msrb.mxu0 %v1623_v26  ;;  %282 = vmatpush.msra.mxu3 %v259_v50  ;;  %v1631_v17 = vld [vmem:[%s1883_s29 + $0x90] sm:$0xff]  ;;  %v1630_v19 = vld [vmem:[%s1883_s29 + $0x88] sm:$0xff]  ;;  %v225_v20 = vld [vmem:[%s1878_s25] sm:$0xff] }
  0x53   :  { %219 = vmatpush.msra.mxu1 %v190_v53  ;;  %249 = vmatpush.msra.mxu2 %v228_v56  ;;  %v1603_v21 = vld [vmem:[%s1873_s21 + $0x80] sm:$0xff]  ;;  %v1602_v24 = vld [vmem:[%s1873_s21 + $0x78] sm:$0xff]  ;;  %v1601_v26 = vld [vmem:[%s1873_s21 + $0x70] sm:$0xff] }
  0x54   :  { %409 = vmatpush.msrb.mxu0 %v1622_v31  ;;  %283 = vmatpush.msra.mxu3 %v258_v54  ;;  %v1612_v22 = vld [vmem:[%s1878_s25 + $0x60] sm:$0xff]  ;;  %v1628_v25 = vld [vmem:[%s1883_s29 + $0x78] sm:$0xff]  ;;  %v1627_v27 = vld [vmem:[%s1883_s29 + $0x70] sm:$0xff]  ;;  %s2504_s25 = sld [smem:[#allocation11_spill]] }
  0x55   :  { %220 = vmatpush.msra.mxu1 %v189_v59  ;;  %250 = vmatpush.msra.mxu2 %v227_v63  ;;  %v1629_v23 = vld [vmem:[%s1883_s29 + $0x80] sm:$0xff]  ;;  %v1600_v28 = vld [vmem:[%s1873_s21 + $0x68] sm:$0xff]  ;;  %v355_v47 = vld [vmem:[%s1888_s3 + $0x18] sm:$0xff] }
  0x56   :  { %410 = vmatpush.msrb.mxu0 %v1621_v34  ;;  %284 = vmatpush.msra.mxu3 %v257_v60  ;;  %v1626_v29 = vld [vmem:[%s1883_s29 + $0x68] sm:$0xff]  ;;  %v1599_v30 = vld [vmem:[%s1873_s21 + $0x60] sm:$0xff]  ;;  %s2503_s21 = sld [smem:[#allocation7_spill]] }
  0x57   :  { %441 = vmatpush.msrb.mxu1 %v1636_v62  ;;  %251 = vmatpush.msra.mxu2 %v226_v5  ;;  %v1625_v31 = vld [vmem:[%s1883_s29 + $0x60] sm:$0xff]  ;;  %v357_v45 = vld [vmem:[%s1888_s3 + $0x28] sm:$0xff]  ;;  %v1642_v5 = vld [vmem:[%s1888_s3 + $0x38] sm:$0xff]  ;;  %s2505_s29 = sld [smem:[#allocation12_spill]] }
  0x58   :  { %411 = vmatpush.msrb.mxu0 %v1620_v36  ;;  %375 = vmatpush.msrb.mxu3 %v1610_v61  ;;  %v356_v46 = vld [vmem:[%s1888_s3 + $0x20] sm:$0xff]  ;;  %v353_v49 = vld [vmem:[%s1888_s3 + $0x8] sm:$0xff] }
  0x59   :  { %442 = vmatpush.msrb.mxu1 %v1635_v2  ;;  %252 = vmatpush.msra.mxu2 %v225_v20  ;;  %v1645_v2 = vld [vmem:[%s1888_s3 + $0x50] sm:$0xff] }
  0x5a   :  { %412 = vmatpush.msrb.mxu0 %v1619_v40  ;;  %376 = vmatpush.msrb.mxu3 %v1609_v1  ;;  %v1646_v1 = vld [vmem:[%s1888_s3 + $0x58] sm:$0xff] }
  0x5b   :  { %443 = vmatpush.msrb.mxu1 %v1634_v8 }
  0x5c   :  { %413 = vmatpush.msrb.mxu0 %v1618_v44  ;;  %377 = vmatpush.msrb.mxu3 %v1608_v7 }
  0x5d   :  { %444 = vmatpush.msrb.mxu1 %v1633_v11  ;;  %v1747_v11 = vld [vmem:[%s1893_s8] ss:$0 sm:$0xff]  ;;  %s2507_s8 = sld [smem:[#allocation17_spill]] }
  0x5e   :  { %414 = vmatpush.msrb.mxu0 %v1617_v48  ;;  %378 = vmatpush.msrb.mxu3 %v1607_v10  ;;  %v354_v48 = vld [vmem:[%s1888_s3 + $0x10] sm:$0xff] }
  0x5f   :  { %445 = vmatpush.msrb.mxu1 %v1632_v13 }
  0x60   :  { %415 = vmatpush.msrb.mxu0 %v1616_v52  ;;  %379 = vmatpush.msrb.mxu3 %v1606_v12 }
  0x61   :  { %446 = vmatpush.msrb.mxu1 %v1631_v17 }
  0x62   :  { %416 = vmatpush.msrb.mxu0 %v1615_v57  ;;  %380 = vmatpush.msrb.mxu3 %v1605_v16 }
  0x63   :  { %447 = vmatpush.msrb.mxu1 %v1630_v19 }
  0x64   :  { %417 = vmatpush.msrb.mxu0 %v1614_v0  ;;  %381 = vmatpush.msrb.mxu3 %v1604_v18  ;;  %v1843_v18 = vmov 96.0  }
  0x65   :  { %448 = vmatpush.msrb.mxu1 %v1629_v23 }
  0x66   :  { %418 = vmatpush.msrb.mxu0 %v1613_v6  ;;  %382 = vmatpush.msrb.mxu3 %v1603_v21 }
  0x67   :  { %449 = vmatpush.msrb.mxu1 %v1628_v25 }
  0x68   :  { %419 = vmatpush.msrb.mxu0 %v1612_v22  ;;  %383 = vmatpush.msrb.mxu3 %v1602_v24 }
  0x69   :  { %450 = vmatpush.msrb.mxu1 %v1627_v27 }
  0x6a   :  { %384 = vmatpush.msrb.mxu3 %v1601_v26 }
  0x6b   :  { %451 = vmatpush.msrb.mxu1 %v1626_v29 }
  0x6c   :  { %385 = vmatpush.msrb.mxu3 %v1600_v28 }
  0x6d   :  { %452 = vmatpush.msrb.mxu1 %v1625_v31  ;;  %v650_v31 = vld [vmem:[%s1908_s24 + $0x110] sm:$0xff] }
  0x6e   :  { %386 = vmatpush.msrb.mxu3 %v1599_v30  ;;  %v649_v30 = vld [vmem:[%s1908_s24 + $0x108] sm:$0xff] }
  0xa9   :  { %v132_v55 = vpop.permute.xlu0 %131  ;;  %v143_v4 = vpop.permute.xlu1 %142 }
  0xaa   :  { %vm144_vm1 = vcmp.eq.s32.totalorder %v128_v3, %v143_v4  ;;  %vm133_vm2 = vcmp.eq.s32.totalorder %v128_v3, %v132_v55  ;;  %v352_v55 = vld [vmem:[%s1888_s3] sm:$0xff] }
  0xab   :  { %v1643_v4 = vld [vmem:[%s1888_s3 + $0x40] sm:$0xff] }
  0xb1   :  { %v137_v9 = vpop.permute.xlu0 %136 }
  0xb2   :  { %vm138_vm3 = vcmp.eq.s32.totalorder %v128_v3, %v137_v9  ;;  %v1644_v3 = vld [vmem:[%s1888_s3 + $0x48] sm:$0xff]  ;;  %v1641_v9 = vld [vmem:[%s1888_s3 + $0x30] sm:$0xff]  ;;  %s2506_s3 = sld [smem:[#allocation15_spill]] }
  0xb3   :  { %vm139_vm4 = vmor %vm133_vm2, %vm138_vm3 }
  0xb4   :  { %vm145_vm6 = vmor %vm139_vm4, %vm144_vm1 }
  0xb5   :  { %v1590_v15 = vsel %vm145_vm6, 1.0, %v1842_v14 }
  0xb6   :  { %1592 = vmatmul.msk.f32.vlgmr.msra.gmra.mxu0 %vm161_vm5, %v1590_v15 }
  0xb7   :  { %667 = vmatpush.msra.mxu0 %v649_v30  ;;  %v767_v30 = vld [vmem:[%s1918_s6 + $0x148] sm:$0xff] }
 0x133   :  { %v2093_v32 = vpop.f32.mrf.mxu0 }
 0x134   :  { %1593 = vmatmul.msk.f32.vlgmr.msra.gmra.mxu1 %vm201_vm7, %v2093_v32  ;;  %1594 = vmatmul.msk.f32.vlgmr.msra.gmra.mxu2 %vm201_vm7, %v2093_v32 }
 0x135   :  { %1595 = vmatmul.msk.f32.vlgmr.msra.gmra.mxu3 %vm201_vm7, %v2093_v32  ;;  %1624 = vmatmul.msk.f32.vlgmr.msrb.gmra.mxu0 %vm201_vm7, %v2093_v32 }
 0x136   :  { %561 = vmatpush.msra.mxu3 %v357_v45  ;;  %687 = vmatpush.msra.mxu1 %v650_v31  ;;  %v634_v45 = vld [vmem:[%s1908_s24 + $0x90] sm:$0xff] }
 0x138   :  { %562 = vmatpush.msra.mxu3 %v356_v46  ;;  %v635_v46 = vld [vmem:[%s1908_s24 + $0x98] sm:$0xff] }
 0x13a   :  { %563 = vmatpush.msra.mxu3 %v355_v47  ;;  %v636_v47 = vld [vmem:[%s1908_s24 + $0xa0] sm:$0xff] }
 0x13c   :  { %1637 = vmatmul.msk.f32.vlgmr.msrb.gmra.mxu1 %vm201_vm7, %v2093_v32  ;;  %564 = vmatpush.msra.mxu3 %v354_v48  ;;  %v631_v48 = vld [vmem:[%s1908_s24 + $0x78] sm:$0xff] }
 0x13d   :  { %1611 = vmatmul.msk.f32.vlgmr.msrb.gmra.mxu3 %vm201_vm7, %v2093_v32 }
 0x13e   :  { %565 = vmatpush.msra.mxu3 %v353_v49  ;;  %v632_v49 = vld [vmem:[%s1908_s24 + $0x80] sm:$0xff] }
 0x140   :  { %566 = vmatpush.msra.mxu3 %v352_v55  ;;  %v626_v55 = vld [vmem:[%s1908_s24 + $0x50] sm:$0xff] }
 0x1b1   :  { %v222_v35 = vpop.f32.mrf.mxu1 }
 0x1b2   :  { %v421_v36 = vpop.f32.mrf.mxu0 }
 0x1b7   :  { %v254_v33 = vpop.f32.mrf.mxu2 }
 0x1b8   :  { %v286_v34 = vpop.f32.mrf.mxu3  ;;  %1596 = vmatpush.xpose.msk.msrb.mxu2 %vm289_vm8, %v254_v33  ;;  %v646_v33 = vld [vmem:[%s1908_s24 + $0xf0] sm:$0xff] }
 0x1b9   :  { %v454_v53 = vpop.f32.mrf.mxu1  ;;  %668 = vmatpush.msra.mxu0 %v646_v33  ;;  %v749_v33 = vld [vmem:[%s1918_s6 + $0xb8] sm:$0xff] }
 0x1bb   :  { %1597 = vmatmul.msk.f32.vlgmr.msrb.gmra.mxu2 %vm289_vm8, %v222_v35  ;;  %v648_v35 = vld [vmem:[%s1908_s24 + $0x100] sm:$0xff] }
 0x1bc   :  { %347 = vmatpush.msra.mxu2 %v286_v34  ;;  %v647_v34 = vld [vmem:[%s1908_s24 + $0xf8] sm:$0xff] }
 0x1bd   :  { %688 = vmatpush.msra.mxu1 %v647_v34  ;;  %v766_v34 = vld [vmem:[%s1918_s6 + $0x140] sm:$0xff] }
 0x1be   :  { %1638 = vmatpush.xpose.msk.msrb.mxu2 %vm289_vm8, %v421_v36  ;;  %v643_v36 = vld [vmem:[%s1908_s24 + $0xd8] sm:$0xff] }
 0x1bf   :  { %669 = vmatpush.msra.mxu0 %v643_v36  ;;  %v732_v36 = vld [vmem:[%s1918_s6 + $0x30] sm:$0xff] }
 0x1c0   :  { %v388_v54 = vpop.f32.mrf.mxu3 }
 0x23e   :  { %v313_v37 = vpop.f32.mrf.mxu2 }
 0x23f   :  { %v316_v38 = vmul.f32 0.10206208, %v313_v37  ;;  %v644_v37 = vld [vmem:[%s1908_s24 + $0xe0] sm:$0xff] }
 0x240   :  { %689 = vmatpush.msra.mxu1 %v644_v37  ;;  %v748_v37 = vld [vmem:[%s1918_s6 + $0xb0] sm:$0xff] }
 0x241   :  { %v318_v39 = vsel %vm317_vm9, %v316_v38, -inf }
 0x242   :  { %319 = vmax.xlane.f32.xlu1 %v318_v39  ;;  %v640_v39 = vld [vmem:[%s1908_s24 + $0xc0] sm:$0xff] }
 0x243   :  { %670 = vmatpush.msra.mxu0 %v640_v39 }
 0x2b5   :  { %v320_v40 = vpop.xlane.xlu1 %319 }
 0x2b6   :  { %v321_v41 = vsub.f32 %v316_v38, %v320_v40  ;;  %v645_v38 = vld [vmem:[%s1908_s24 + $0xe8] sm:$0xff] }
 0x2b7   :  { %v641_v40 = vld [vmem:[%s1908_s24 + $0xc8] sm:$0xff] }
 0x2b8   :  { %v322_v42 = vmul.f32 1.442695, %v321_v41  ;;  %v642_v41 = vld [vmem:[%s1908_s24 + $0xd0] sm:$0xff]  ;;  %690 = vmatpush.msra.mxu1 %v641_v40  ;;  %v731_v40 = vld [vmem:[%s1918_s6 + $0x28] sm:$0xff] }
 0x2ba   :  { %1759 = vpow2.f32 %v322_v42  ;;  %v637_v42 = vld [vmem:[%s1908_s24 + $0xa8] sm:$0xff] }
 0x2bb   :  { %671 = vmatpush.msra.mxu0 %v637_v42  ;;  %v764_v42 = vld [vmem:[%s1918_s6 + $0x130] sm:$0xff] }
 0x2bd   :  { %672 = vmatpush.msra.mxu0 %v634_v45  ;;  %v746_v45 = vld [vmem:[%s1918_s6 + $0xa0] sm:$0xff] }
 0x2bf   :  { %673 = vmatpush.msra.mxu0 %v631_v48  ;;  %v745_v48 = vld [vmem:[%s1918_s6 + $0x98] sm:$0xff] }
 0x2c0   :  { %v1760_v43 = vpop.eup %1759 }
 0x2c1   :  { %v324_v44 = vsel %vm317_vm9, %v1760_v43, 0.0 }
 0x2c2   :  { %325 = vadd.xlane.f32.xlu2 %v324_v44  ;;  %v639_v44 = vld [vmem:[%s1908_s24 + $0xb8] sm:$0xff] }
 0x335   :  { %v326_v50 = vpop.xlane.xlu2 %325 }
 0x336   :  { %1761 = vrcp.f32 %v326_v50  ;;  %v633_v50 = vld [vmem:[%s1908_s24 + $0x88] sm:$0xff] }
 0x33c   :  { %v1762_v51 = vpop.eup %1761 }
 0x33d   :  { %v328_v52 = vmul.f32 %v1762_v51, %v1760_v43  ;;  %v638_v43 = vld [vmem:[%s1908_s24 + $0xb0] sm:$0xff]  ;;  %v628_v51 = vld [vmem:[%s1908_s24 + $0x60] sm:$0xff] }
 0x33e   :  { %691 = vmatpush.msra.mxu1 %v638_v43  ;;  %674 = vmatpush.msra.mxu0 %v628_v51 }
 0x33f   :  { %1598 = vmatmul.msk.f32.vlgmr.msra.gmra.mxu2 %vm317_vm9, %v328_v52  ;;  %v629_v52 = vld [vmem:[%s1908_s24 + $0x68] sm:$0xff] }
 0x340   :  { %513 = vmatpush.msra.mxu2 %v454_v53  ;;  %692 = vmatpush.msra.mxu1 %v635_v46  ;;  %v630_v53 = vld [vmem:[%s1908_s24 + $0x70] sm:$0xff] }
 0x342   :  { %693 = vmatpush.msra.mxu1 %v632_v49  ;;  %v1748_v49 = vld [vmem:[%s1898_s14] ss:$0 sm:$0xff]  ;;  %s2508_s14 = sld [smem:[#allocation13_spill]] }
 0x344   :  { %694 = vmatpush.msra.mxu1 %v629_v52  ;;  %v1749_v52 = vld [vmem:[%s1903_s19] ss:$0 sm:$0xff]  ;;  %s2509_s19 = sld [smem:[#allocation14_spill]] }
 0x346   :  { %695 = vmatpush.msra.mxu1 %v626_v55  ;;  %v728_v55 = vld [vmem:[%s1918_s6 + $0x10] sm:$0xff] }
 0x347   :  { %1639 = vmatmul.msk.f32.vlgmr.msrb.gmra.mxu2 %vm289_vm8, %v388_v54  ;;  %v625_v54 = vld [vmem:[%s1908_s24 + $0x48] sm:$0xff] }
 0x348   :  { %538 = vmatpush.msrb.mxu2 %v1646_v1  ;;  %675 = vmatpush.msra.mxu0 %v625_v54  ;;  %v618_v1 = vld [vmem:[%s1908_s24 + $0x10] sm:$0xff] }
 0x34a   :  { %539 = vmatpush.msrb.mxu2 %v1645_v2  ;;  %v741_v2 = vld [vmem:[%s1918_s6 + $0x78] sm:$0xff] }
 0x34b   :  { %778 = vmatpush.msrb.mxu3 %v741_v2  ;;  %v652_v2 = vld [vmem:[%s1913_s30] sm:$0x7]  ;;  %s1844_s30 = smov [#allocation2]  }
 0x34c   :  { %540 = vmatpush.msrb.mxu2 %v1644_v3  ;;  %v757_v3 = vld [vmem:[%s1918_s6 + $0xf8] sm:$0xff] }
 0x34e   :  { %541 = vmatpush.msrb.mxu2 %v1643_v4  ;;  %v740_v4 = vld [vmem:[%s1918_s6 + $0x70] sm:$0xff] }
 0x34f   :  { %779 = vmatpush.msrb.mxu3 %v740_v4  ;;  %v655_v4 = vperm.slane %v652_v2, 1 }
 0x350   :  { %542 = vmatpush.msrb.mxu2 %v1642_v5  ;;  %v756_v5 = vld [vmem:[%s1918_s6 + $0xf0] sm:$0xff] }
 0x352   :  { %543 = vmatpush.msrb.mxu2 %v1641_v9  ;;  %v773_v9 = vld [vmem:[%s1918_s6 + $0x178] sm:$0xff] }
 0x3c2   :  { %v349_v56 = vpop.f32.mrf.mxu2 }
 0x3c3   :  { %1648 = vmatmul.msk.f32.vlgmr.msra.gmra.mxu3 %vm289_vm8, %v349_v56  ;;  %v627_v56 = vld [vmem:[%s1908_s24 + $0x58] sm:$0xff] }
 0x3ca   :  { %v480_v57 = vpop.f32.mrf.mxu2 }
 0x3cb   :  { %v483_v58 = vmul.f32 0.10206208, %v480_v57  ;;  %v622_v57 = vld [vmem:[%s1908_s24 + $0x30] sm:$0xff] }
 0x3cc   :  { %676 = vmatpush.msra.mxu0 %v622_v57  ;;  %v763_v57 = vld [vmem:[%s1918_s6 + $0x128] sm:$0xff] }
 0x3cd   :  { %v484_v59 = vsel %vm317_vm9, %v483_v58, -inf }
 0x3ce   :  { %485 = vmax.xlane.f32.xlu2 %v484_v59  ;;  %v624_v59 = vld [vmem:[%s1908_s24 + $0x40] sm:$0xff] }
 0x441   :  { %v486_v60 = vpop.xlane.xlu2 %485 }
 0x442   :  { %v487_v61 = vsub.f32 %v483_v58, %v486_v60  ;;  %v623_v58 = vld [vmem:[%s1908_s24 + $0x38] sm:$0xff] }
 0x443   :  { %696 = vmatpush.msra.mxu1 %v623_v58  ;;  %v619_v60 = vld [vmem:[%s1908_s24 + $0x18] sm:$0xff]  ;;  %v743_v58 = vld [vmem:[%s1918_s6 + $0x88] sm:$0xff] }
 0x444   :  { %v488_v62 = vmul.f32 1.442695, %v487_v61  ;;  %v620_v61 = vld [vmem:[%s1908_s24 + $0x20] sm:$0xff]  ;;  %677 = vmatpush.msra.mxu0 %v619_v60 }
 0x445   :  { %697 = vmatpush.msra.mxu1 %v620_v61  ;;  %v726_v60 = vld [vmem:[%s1918_s6] sm:$0xff] }
 0x446   :  { %1763 = vpow2.f32 %v488_v62  ;;  %v568_v12 = vpop.f32.mrf.mxu3  ;;  %v621_v62 = vld [vmem:[%s1908_s24 + $0x28] sm:$0xff]  ;;  %v742_v61 = vld [vmem:[%s1918_s6 + $0x80] sm:$0xff] }
 0x44c   :  { %v1764_v63 = vpop.eup %1763 }
 0x44d   :  { %v490_v0 = vsel %vm317_vm9, %v1764_v63, 0.0 }
 0x44e   :  { %491 = vadd.xlane.f32.xlu0 %v490_v0  ;;  %v617_v0 = vld [vmem:[%s1908_s24 + $0x8] sm:$0xff] }
 0x44f   :  { %698 = vmatpush.msra.mxu1 %v617_v0  ;;  %v759_v0 = vld [vmem:[%s1918_s6 + $0x108] sm:$0xff] }
 0x451   :  { %818 = vmatpush.msrb.mxu1 %v773_v9 }
 0x4c1   :  { %v492_v6 = vpop.xlane.xlu0 %491 }
 0x4c2   :  { %1765 = vrcp.f32 %v492_v6 }
 0x4c3   :  { %1767 = vrcp.f32 %v1843_v18  ;;  %v770_v18 = vld [vmem:[%s1918_s6 + $0x160] sm:$0xff] }
 0x4c8   :  { %v1766_v7 = vpop.eup %1765 }
 0x4c9   :  { %v494_v8 = vmul.f32 %v1766_v7, %v1764_v63  ;;  %v1768_v19 = vpop.eup %1767  ;;  %v616_v63 = vld [vmem:[%s1908_s24] sm:$0xff]  ;;  %v739_v7 = vld [vmem:[%s1918_s6 + $0x68] sm:$0xff] }
 0x4ca   :  { %v583_v20 = vmul.f32 96.0, %v1768_v19  ;;  %vm587_vm10 = vweird.f32 %v1768_v19  ;;  %678 = vmatpush.msra.mxu0 %v616_v63  ;;  %780 = vmatpush.msrb.mxu3 %v739_v7  ;;  %v760_v63 = vld [vmem:[%s1918_s6 + $0x110] sm:$0xff] }
 0x4cb   :  { %1640 = vmatmul.msk.f32.vlgmr.msra.gmra.mxu2 %vm317_vm9, %v494_v8  ;;  %v755_v8 = vld [vmem:[%s1918_s6 + $0xe8] sm:$0xff] }
 0x4cc   :  { %v584_v21 = vsub.f32 1.0, %v583_v20  ;;  %798 = vmatpush.msrb.mxu0 %v757_v3  ;;  %v752_v20 = vld [vmem:[%s1918_s6 + $0xd0] sm:$0xff]  ;;  %v654_v3 = vperm.slane %v652_v2, 0 }
 0x4ce   :  { %v585_v22 = vmul.f32 %v1768_v19, %v584_v21  ;;  %799 = vmatpush.msrb.mxu0 %v756_v5  ;;  %v769_v21 = vld [vmem:[%s1918_s6 + $0x158] sm:$0xff] }
 0x4d0   :  { %v586_v23 = vadd.f32 %v1768_v19, %v585_v22  ;;  %800 = vmatpush.msrb.mxu0 %v755_v8  ;;  %v735_v22 = vld [vmem:[%s1918_s6 + $0x48] sm:$0xff] }
 0x4d2   :  { %v2134_v24 = vsel %vm587_vm10, %v1768_v19, %v586_v23  ;;  %v736_v19 = vld [vmem:[%s1918_s6 + $0x50] sm:$0xff]  ;;  %v751_v23 = vld [vmem:[%s1918_s6 + $0xc8] sm:$0xff] }
 0x54e   :  { %v515_v10 = vpop.f32.mrf.mxu2 }
 0x54f   :  { %1647 = vmatmul.msk.f32.vlgmr.msrb.gmra.mxu2 %vm289_vm8, %v515_v10 }
 0x5d2   :  { %v545_v13 = vpop.f32.mrf.mxu2 }
 0x5d3   :  { %v569_v14 = vadd.f32 %v568_v12, %v545_v13  ;;  %v738_v12 = vld [vmem:[%s1918_s6 + $0x60] sm:$0xff] }
 0x5d4   :  { %v754_v13 = vld [vmem:[%s1918_s6 + $0xe0] sm:$0xff]  ;;  %781 = vmatpush.msrb.mxu3 %v738_v12 }
 0x5d5   :  { %v575_v15 = vadd.f32 %v1747_v11, %v569_v14  ;;  %v772_v11 = vld [vmem:[%s1918_s6 + $0x170] sm:$0xff]  ;;  %801 = vmatpush.msrb.mxu0 %v754_v13 }
 0x5d6   :  { %819 = vmatpush.msrb.mxu1 %v772_v11  ;;  %v656_v11 = vperm.slane %v652_v2, 2  ;;  %v940_v2 = vld [vmem:[%s2501_s13 + $0x10] sm:$0xff] }
 0x5d7   :  { %v576_v16 = vadd.f32 %v575_v15, %v2093_v32  ;;  %v651_v32 = vld [vmem:[%s1908_s24 + $0x118] sm:$0xff]  ;;  %v771_v15 = vld [vmem:[%s1918_s6 + $0x168] sm:$0xff]  ;;  %s2510_s24 = sld [smem:[#allocation16_spill]] }
 0x5d8   :  { %707 = vmatpush.msra.mxu2 %v651_v32  ;;  %820 = vmatpush.msrb.mxu1 %v771_v15  ;;  %v733_v32 = vld [vmem:[%s1918_s6 + $0x38] sm:$0xff]  ;;  %v1750_v15 = vld [vmem:[%s2498_s0] ss:$0 sm:$0xff] }
 0x5d9   :  { %v579_v17 = vsel %vm201_vm7, %v576_v16, 0.0 }
 0x5da   :  { %580 = vadd.xlane.f32.xlu2 %v579_v17  ;;  %708 = vmatpush.msra.mxu2 %v648_v35  ;;  %v753_v17 = vld [vmem:[%s1918_s6 + $0xd8] sm:$0xff] }
 0x5db   :  { %802 = vmatpush.msrb.mxu0 %v753_v17  ;;  %821 = vmatpush.msrb.mxu1 %v770_v18 }
 0x5dc   :  { %709 = vmatpush.msra.mxu2 %v645_v38  ;;  %v765_v38 = vld [vmem:[%s1918_s6 + $0x138] sm:$0xff] }
 0x5dd   :  { %803 = vmatpush.msrb.mxu0 %v752_v20  ;;  %822 = vmatpush.msrb.mxu1 %v769_v21 }
 0x5de   :  { %710 = vmatpush.msra.mxu2 %v642_v41  ;;  %v747_v41 = vld [vmem:[%s1918_s6 + $0xa8] sm:$0xff] }
 0x5df   :  { %804 = vmatpush.msrb.mxu0 %v751_v23 }
 0x5e0   :  { %711 = vmatpush.msra.mxu2 %v639_v44  ;;  %v730_v44 = vld [vmem:[%s1918_s6 + $0x20] sm:$0xff] }
 0x5e2   :  { %712 = vmatpush.msra.mxu2 %v636_v47  ;;  %v729_v47 = vld [vmem:[%s1918_s6 + $0x18] sm:$0xff] }
 0x5e4   :  { %713 = vmatpush.msra.mxu2 %v633_v50 }
 0x5e6   :  { %714 = vmatpush.msra.mxu2 %v630_v53 }
 0x5e8   :  { %715 = vmatpush.msra.mxu2 %v627_v56  ;;  %v744_v56 = vld [vmem:[%s1918_s6 + $0x90] sm:$0xff] }
 0x5ea   :  { %716 = vmatpush.msra.mxu2 %v624_v59  ;;  %v762_v59 = vld [vmem:[%s1918_s6 + $0x120] sm:$0xff] }
 0x5ec   :  { %717 = vmatpush.msra.mxu2 %v621_v62  ;;  %v761_v62 = vld [vmem:[%s1918_s6 + $0x118] sm:$0xff] }
 0x5ee   :  { %718 = vmatpush.msra.mxu2 %v618_v1  ;;  %v758_v1 = vld [vmem:[%s1918_s6 + $0x100] sm:$0xff] }
 0x64d   :  { %v581_v25 = vpop.xlane.xlu2 %580 }
 0x64e   :  { %v589_v26 = vmul.f32 %v2134_v24, %v581_v25  ;;  %v768_v25 = vld [vmem:[%s1918_s6 + $0x150] sm:$0xff] }
 0x64f   :  { %823 = vmatpush.msrb.mxu1 %v768_v25  ;;  %v917_v25 = vld [vmem:[%s2499_s5 + $0x58] sm:$0xff] }
 0x650   :  { %v2137_v27 = vsub.f32 %v576_v16, %v589_v26  ;;  %v737_v16 = vld [vmem:[%s1918_s6 + $0x58] sm:$0xff]  ;;  %v734_v26 = vld [vmem:[%s1918_s6 + $0x40] sm:$0xff] }
 0x651   :  { %782 = vmatpush.msrb.mxu3 %v737_v16  ;;  %824 = vmatpush.msrb.mxu1 %v767_v30  ;;  %v913_v30 = vld [vmem:[%s2499_s5 + $0x38] sm:$0xff] }
 0x652   :  { %v591_v28 = vmul.f32 %v2137_v27, %v2137_v27 }
 0x653   :  { %783 = vmatpush.msrb.mxu3 %v736_v19  ;;  %825 = vmatpush.msrb.mxu1 %v766_v34 }
 0x654   :  { %v592_v29 = vsel %vm201_vm7, %v591_v28, 0.0  ;;  %v750_v28 = vld [vmem:[%s1918_s6 + $0xc0] sm:$0xff] }
 0x655   :  { %593 = vadd.xlane.f32.xlu2 %v592_v29  ;;  %784 = vmatpush.msrb.mxu3 %v735_v22 }
 0x656   :  { %805 = vmatpush.msrb.mxu0 %v750_v28  ;;  %826 = vmatpush.msrb.mxu1 %v765_v38  ;;  %v915_v28 = vld [vmem:[%s2499_s5 + $0x48] sm:$0xff]  ;;  %v910_v38 = vld [vmem:[%s2499_s5 + $0x20] sm:$0xff] }
 0x657   :  { %785 = vmatpush.msrb.mxu3 %v734_v26  ;;  %v916_v26 = vld [vmem:[%s2499_s5 + $0x50] sm:$0xff] }
 0x658   :  { %806 = vmatpush.msrb.mxu0 %v749_v33  ;;  %827 = vmatpush.msrb.mxu1 %v764_v42  ;;  %v881_v42 = vld [vmem:[%s2500_s9 + $0x50] sm:$0xff] }
 0x659   :  { %786 = vmatpush.msrb.mxu3 %v733_v32 }
 0x65a   :  { %807 = vmatpush.msrb.mxu0 %v748_v37  ;;  %828 = vmatpush.msrb.mxu1 %v763_v57  ;;  %v911_v37 = vld [vmem:[%s2499_s5 + $0x28] sm:$0xff] }
 0x65b   :  { %787 = vmatpush.msrb.mxu3 %v732_v36  ;;  %v912_v36 = vld [vmem:[%s2499_s5 + $0x30] sm:$0xff]  ;;  %v876_v57 = vld [vmem:[%s2500_s9 + $0x28] sm:$0xff] }
 0x65c   :  { %808 = vmatpush.msrb.mxu0 %v747_v41  ;;  %829 = vmatpush.msrb.mxu1 %v762_v59  ;;  %v909_v41 = vld [vmem:[%s2499_s5 + $0x18] sm:$0xff]  ;;  %v875_v59 = vld [vmem:[%s2500_s9 + $0x20] sm:$0xff] }
 0x65d   :  { %788 = vmatpush.msrb.mxu3 %v731_v40  ;;  %v949_v40 = vld [vmem:[%s2501_s13 + $0x58] sm:$0xff] }
 0x65e   :  { %809 = vmatpush.msrb.mxu0 %v746_v45  ;;  %830 = vmatpush.msrb.mxu1 %v761_v62  ;;  %v880_v45 = vld [vmem:[%s2500_s9 + $0x48] sm:$0xff]  ;;  %v874_v62 = vld [vmem:[%s2500_s9 + $0x18] sm:$0xff] }
 0x65f   :  { %789 = vmatpush.msrb.mxu3 %v730_v44  ;;  %v908_v44 = vld [vmem:[%s2499_s5 + $0x10] sm:$0xff] }
 0x660   :  { %810 = vmatpush.msrb.mxu0 %v745_v48  ;;  %831 = vmatpush.msrb.mxu1 %v760_v63  ;;  %v879_v48 = vld [vmem:[%s2500_s9 + $0x40] sm:$0xff]  ;;  %v941_v63 = vld [vmem:[%s2501_s13 + $0x18] sm:$0xff] }
 0x661   :  { %790 = vmatpush.msrb.mxu3 %v729_v47  ;;  %v907_v47 = vld [vmem:[%s2499_s5 + $0x8] sm:$0xff] }
 0x662   :  { %811 = vmatpush.msrb.mxu0 %v744_v56  ;;  %832 = vmatpush.msrb.mxu1 %v759_v0  ;;  %v1681_v56 = vld [vmem:[%s2499_s5 + $0xb0] sm:$0xff]  ;;  %v1678_v0 = vld [vmem:[%s2499_s5 + $0x98] sm:$0xff] }
 0x663   :  { %791 = vmatpush.msrb.mxu3 %v728_v55  ;;  %v944_v55 = vld [vmem:[%s2501_s13 + $0x30] sm:$0xff] }
 0x664   :  { %812 = vmatpush.msrb.mxu0 %v743_v58  ;;  %833 = vmatpush.msrb.mxu1 %v758_v1  ;;  %v1680_v58 = vld [vmem:[%s2499_s5 + $0xa8] sm:$0xff]  ;;  %v873_v1 = vld [vmem:[%s2500_s9 + $0x10] sm:$0xff] }
 0x666   :  { %813 = vmatpush.msrb.mxu0 %v742_v61  ;;  %v1679_v61 = vld [vmem:[%s2499_s5 + $0xa0] sm:$0xff] }
 0x6c8   :  { %v594_v6 = vpop.xlane.xlu2 %593 }
 0x6c9   :  { %v595_v10 = vmul.f32 %v594_v6, %v2134_v24 }
 0x6cb   :  { %v2189_v14 = vadd.f32 1e-05, %v595_v10 }
 0x6cd   :  { %1769 = vrsqrt.f32 %v2189_v14  ;;  %vm603_vm12 = vweird.f32 %v2189_v14 }
 0x6d3   :  { %v1770_v29 = vpop.eup %1769 }
 0x6d4   :  { %v598_v31 = vmul.f32 %v1770_v29, %v2189_v14  ;;  %vm604_vm11 = vweird.f32 %v1770_v29 }
 0x6d5   :  { %vm605_vm13 = vmor %vm603_vm12, %vm604_vm11 }
 0x6d6   :  { %v599_v35 = vmul.f32 %v1770_v29, %v598_v31 }
 0x6d8   :  { %v600_v39 = vmul.f32 0.5, %v599_v35 }
 0x6da   :  { %v601_v43 = vsub.f32 1.5, %v600_v39  ;;  %v882_v39 = vld [vmem:[%s2500_s9 + $0x58] sm:$0xff] }
 0x6db   :  { %890 = vmatpush.msrb.mxu2 %v882_v39  ;;  %v1664_v39 = vld [vmem:[%s2500_s9 + $0x90] sm:$0xff] }
 0x6dc   :  { %v602_v46 = vmul.f32 %v1770_v29, %v601_v43  ;;  %v948_v43 = vld [vmem:[%s2501_s13 + $0x50] sm:$0xff] }
 0x6dd   :  { %891 = vmatpush.msrb.mxu2 %v881_v42  ;;  %v1661_v42 = vld [vmem:[%s2500_s9 + $0x78] sm:$0xff] }
 0x6de   :  { %v606_v50 = vsel %vm605_vm13, %v1770_v29, %v602_v46  ;;  %v914_v29 = vld [vmem:[%s2499_s5 + $0x40] sm:$0xff]  ;;  %v947_v46 = vld [vmem:[%s2501_s13 + $0x48] sm:$0xff] }
 0x6df   :  { %v607_v51 = vmul.f32 %v606_v50, %v2137_v27  ;;  %v727_v27 = vld [vmem:[%s1918_s6 + $0x8] sm:$0xff]  ;;  %892 = vmatpush.msrb.mxu2 %v880_v45  ;;  %v906_v50 = vld [vmem:[%s2499_s5] sm:$0xff]  ;;  %s1549_s6 = sshll.u32 %s1844_s30, 4  ;;  %s1550_s6 = int_to_ptr.vmem [resolvable:$true] %s1549_s6 }
 0x6e0   :  { %792 = vmatpush.msrb.mxu3 %v727_v27  ;;  %v943_v27 = vld [vmem:[%s2501_s13 + $0x28] sm:$0xff]  ;;  %v1658_v45 = vld [vmem:[%s2500_s9 + $0x60] sm:$0xff] }
 0x6e1   :  { %v611_v53 = vmul.f32 %v1748_v49, %v607_v51  ;;  %v946_v49 = vld [vmem:[%s2501_s13 + $0x40] sm:$0xff]  ;;  %893 = vmatpush.msrb.mxu2 %v879_v48  ;;  %v878_v51 = vld [vmem:[%s2500_s9 + $0x38] sm:$0xff] }
 0x6e2   :  { %793 = vmatpush.msrb.mxu3 %v726_v60  ;;  %v942_v60 = vld [vmem:[%s2501_s13 + $0x20] sm:$0xff] }
 0x6e3   :  { %v615_v54 = vadd.f32 %v1749_v52, %v611_v53  ;;  %v945_v52 = vld [vmem:[%s2501_s13 + $0x38] sm:$0xff]  ;;  %894 = vmatpush.msrb.mxu2 %v878_v51 }
 0x6e4   :  { %922 = vmatpush.msra.mxu3 %v917_v25  ;;  %v1682_v53 = vld [vmem:[%s2499_s5 + $0xb8] sm:$0xff] }
 0x6e5   :  { %1649 = vmatmul.msk.f32.vlgmr.msra.gmra.mxu0 %vm201_vm7, %v615_v54  ;;  %1650 = vmatmul.msk.f32.vlgmr.msra.gmra.mxu1 %vm201_vm7, %v615_v54 }
 0x6e6   :  { %1651 = vmatmul.msk.f32.vlgmr.msra.gmra.mxu2 %vm201_vm7, %v615_v54  ;;  %923 = vmatpush.msra.mxu3 %v916_v26  ;;  %v1752_v26 = vld [vmem:[%s2503_s21] ss:$0 sm:$0xff] }
 0x6e7   :  { %954 = vmatpush.msra.mxu0 %v949_v40  ;;  %v1663_v40 = vld [vmem:[%s2500_s9 + $0x88] sm:$0xff] }
 0x6e8   :  { %924 = vmatpush.msra.mxu3 %v915_v28 }
 0x6e9   :  { %955 = vmatpush.msra.mxu0 %v948_v43  ;;  %v1660_v43 = vld [vmem:[%s2500_s9 + $0x70] sm:$0xff] }
 0x6ea   :  { %925 = vmatpush.msra.mxu3 %v914_v29 }
 0x6eb   :  { %956 = vmatpush.msra.mxu0 %v947_v46 }
 0x6ec   :  { %926 = vmatpush.msra.mxu3 %v913_v30 }
 0x6ed   :  { %957 = vmatpush.msra.mxu0 %v946_v49 }
 0x6ee   :  { %927 = vmatpush.msra.mxu3 %v912_v36  ;;  %v1667_v36 = vld [vmem:[%s2500_s9 + $0xa8] sm:$0xff] }
 0x6ef   :  { %958 = vmatpush.msra.mxu0 %v945_v52 }
 0x6f0   :  { %928 = vmatpush.msra.mxu3 %v911_v37  ;;  %v1666_v37 = vld [vmem:[%s2500_s9 + $0xa0] sm:$0xff] }
 0x6f1   :  { %959 = vmatpush.msra.mxu0 %v944_v55  ;;  %v1694_v55 = vld [vmem:[%s2501_s13 + $0xb0] sm:$0xff] }
 0x6f2   :  { %929 = vmatpush.msra.mxu3 %v910_v38  ;;  %v1665_v38 = vld [vmem:[%s2500_s9 + $0x98] sm:$0xff] }
 0x6f3   :  { %960 = vmatpush.msra.mxu0 %v943_v27 }
 0x6f4   :  { %930 = vmatpush.msra.mxu3 %v909_v41  ;;  %v1662_v41 = vld [vmem:[%s2500_s9 + $0x80] sm:$0xff] }
 0x6f5   :  { %961 = vmatpush.msra.mxu0 %v942_v60 }
 0x6f6   :  { %931 = vmatpush.msra.mxu3 %v908_v44  ;;  %v1659_v44 = vld [vmem:[%s2500_s9 + $0x68] sm:$0xff] }
 0x6f7   :  { %962 = vmatpush.msra.mxu0 %v941_v63  ;;  %v1690_v63 = vld [vmem:[%s2501_s13 + $0x90] sm:$0xff] }
 0x6f8   :  { %932 = vmatpush.msra.mxu3 %v907_v47 }
 0x6f9   :  { %963 = vmatpush.msra.mxu0 %v940_v2  ;;  %v1687_v2 = vld [vmem:[%s2501_s13 + $0x78] sm:$0xff] }
 0x6fa   :  { %933 = vmatpush.msra.mxu3 %v906_v50 }
 0x762   :  { %v680_v5 = vpop.f32.mrf.mxu0  ;;  %v700_v6 = vpop.f32.mrf.mxu1 }
 0x763   :  { %v681_v7 = vadd.f32 %v680_v5, %v654_v3  ;;  %v701_v8 = vadd.f32 %v700_v6, %v655_v4  ;;  %v1677_v3 = vld [vmem:[%s2499_s5 + $0x90] sm:$0xff]  ;;  %v872_v4 = vld [vmem:[%s2500_s9 + $0x8] sm:$0xff] }
 0x764   :  { %v939_v5 = vld [vmem:[%s2501_s13 + $0x8] sm:$0xff] }
 0x765   :  { %v723_v9 = vmax.f32 %v681_v7, 0.0  ;;  %v724_v10 = vmax.f32 %v701_v8, 0.0  ;;  %v1676_v6 = vld [vmem:[%s2499_s5 + $0x88] sm:$0xff]  ;;  %964 = vmatpush.msra.mxu0 %v939_v5  ;;  %v871_v7 = vld [vmem:[%s2500_s9] sm:$0xff] }
 0x766   :  { %v938_v8 = vld [vmem:[%s2501_s13] sm:$0xff] }
 0x767   :  { %794 = vmatmul.f32.vlgmr.msrb.gmra.mxu3 %v723_v9  ;;  %814 = vmatmul.f32.vlgmr.msrb.gmra.mxu0 %v724_v10  ;;  %v1675_v9 = vld [vmem:[%s2499_s5 + $0x80] sm:$0xff]  ;;  %v1674_v10 = vld [vmem:[%s2499_s5 + $0x78] sm:$0xff] }
 0x768   :  { %1087 = vmatpush.msrb.mxu3 %v1682_v53  ;;  %965 = vmatpush.msra.mxu0 %v938_v8  ;;  %v1684_v5 = vld [vmem:[%s2501_s13 + $0x60] sm:$0xff] }
 0x769   :  { %v720_v12 = vpop.f32.mrf.mxu2 }
 0x76a   :  { %v721_v13 = vadd.f32 %v720_v12, %v656_v11  ;;  %1088 = vmatpush.msrb.mxu3 %v1681_v56  ;;  %v1673_v11 = vld [vmem:[%s2499_s5 + $0x70] sm:$0xff]  ;;  %v1693_v56 = vld [vmem:[%s2501_s13 + $0xa8] sm:$0xff] }
 0x76c   :  { %v725_v14 = vmax.f32 %v721_v13, 0.0  ;;  %1089 = vmatpush.msrb.mxu3 %v1680_v58 }
 0x76e   :  { %834 = vmatmul.f32.vlgmr.msrb.gmra.mxu1 %v725_v14  ;;  %1090 = vmatpush.msrb.mxu3 %v1679_v61  ;;  %v1672_v14 = vld [vmem:[%s2499_s5 + $0x68] sm:$0xff]  ;;  %v1692_v61 = vld [vmem:[%s2501_s13 + $0xa0] sm:$0xff] }
 0x770   :  { %1091 = vmatpush.msrb.mxu3 %v1678_v0  ;;  %v1689_v0 = vld [vmem:[%s2501_s13 + $0x88] sm:$0xff] }
 0x772   :  { %1092 = vmatpush.msrb.mxu3 %v1677_v3  ;;  %v1686_v3 = vld [vmem:[%s2501_s13 + $0x70] sm:$0xff] }
 0x774   :  { %1093 = vmatpush.msrb.mxu3 %v1676_v6 }
 0x776   :  { %1094 = vmatpush.msrb.mxu3 %v1675_v9 }
 0x778   :  { %1095 = vmatpush.msrb.mxu3 %v1674_v10 }
 0x77a   :  { %1096 = vmatpush.msrb.mxu3 %v1673_v11 }
 0x77c   :  { %1097 = vmatpush.msrb.mxu3 %v1672_v14 }
 0x7e4   :  { %v815_v18 = vpop.f32.mrf.mxu0 }
 0x7ea   :  { %v795_v16 = vpop.f32.mrf.mxu3 }
 0x7eb   :  { %v796_v17 = vadd.f32 %v1750_v15, %v795_v16  ;;  %v835_v20 = vpop.f32.mrf.mxu1  ;;  %v1671_v16 = vld [vmem:[%s2499_s5 + $0x60] sm:$0xff] }
 0x7ec   :  { %1098 = vmatpush.msrb.mxu3 %v1671_v16  ;;  %v1704_v16 = vld [vmem:[%s2504_s25 + $0x50] sm:$0xff] }
 0x7ed   :  { %v816_v19 = vadd.f32 %v815_v18, %v796_v17 }
 0x7ef   :  { %v836_v21 = vadd.f32 %v835_v20, %v816_v19 }
 0x7f1   :  { %v838_v22 = vadd.f32 %v836_v21, %v615_v54  ;;  %v877_v54 = vld [vmem:[%s2500_s9 + $0x30] sm:$0xff] }
 0x7f2   :  { %895 = vmatpush.msrb.mxu2 %v877_v54  ;;  %v1695_v54 = vld [vmem:[%s2501_s13 + $0xb8] sm:$0xff] }
 0x7f3   :  { %v841_v23 = vsel %vm201_vm7, %v838_v22, 0.0 }
 0x7f4   :  { %842 = vadd.xlane.f32.xlu2 %v841_v23  ;;  %896 = vmatpush.msrb.mxu2 %v876_v57  ;;  %v1751_v23 = vld [vmem:[%s2502_s17] ss:$0 sm:$0xff] }
 0x7f6   :  { %897 = vmatpush.msrb.mxu2 %v875_v59 }
 0x7f8   :  { %898 = vmatpush.msrb.mxu2 %v874_v62  ;;  %v1691_v62 = vld [vmem:[%s2501_s13 + $0x98] sm:$0xff] }
 0x7fa   :  { %899 = vmatpush.msrb.mxu2 %v873_v1  ;;  %v1688_v1 = vld [vmem:[%s2501_s13 + $0x80] sm:$0xff] }
 0x7fc   :  { %900 = vmatpush.msrb.mxu2 %v872_v4  ;;  %v1685_v4 = vld [vmem:[%s2501_s13 + $0x68] sm:$0xff] }
 0x7fe   :  { %901 = vmatpush.msrb.mxu2 %v871_v7 }
 0x867   :  { %v843_v31 = vpop.xlane.xlu2 %842 }
 0x868   :  { %v844_v32 = vmul.f32 %v843_v31, %v2134_v24 }
 0x86a   :  { %v2247_v33 = vsub.f32 %v838_v22, %v844_v32  ;;  %v1669_v32 = vld [vmem:[%s2500_s9 + $0xb8] sm:$0xff] }
 0x86c   :  { %v846_v34 = vmul.f32 %v2247_v33, %v2247_v33 }
 0x86e   :  { %v847_v35 = vsel %vm201_vm7, %v846_v34, 0.0  ;;  %v1668_v34 = vld [vmem:[%s2500_s9 + $0xb0] sm:$0xff] }
 0x86f   :  { %848 = vadd.xlane.f32.xlu2 %v847_v35 }
 0x8e2   :  { %v849_v12 = vpop.xlane.xlu2 %848 }
 0x8e3   :  { %v850_v13 = vmul.f32 %v849_v12, %v2134_v24 }
 0x8e5   :  { %v851_v15 = vadd.f32 1e-05, %v850_v13 }
 0x8e7   :  { %1771 = vrsqrt.f32 %v851_v15  ;;  %vm858_vm15 = vweird.f32 %v851_v15 }
 0x8ed   :  { %v1772_v17 = vpop.eup %1771 }
 0x8ee   :  { %v853_v18 = vmul.f32 %v1772_v17, %v851_v15  ;;  %vm859_vm14 = vweird.f32 %v1772_v17  ;;  %v1705_v15 = vld [vmem:[%s2504_s25 + $0x58] sm:$0xff] }
 0x8ef   :  { %vm860_vm0 = vmor %vm858_vm15, %vm859_vm14 }
 0x8f0   :  { %v854_v19 = vmul.f32 %v1772_v17, %v853_v18  ;;  %v1703_v18 = vld [vmem:[%s2504_s25 + $0x48] sm:$0xff] }
 0x8f2   :  { %v855_v20 = vmul.f32 0.5, %v854_v19 }
 0x8f4   :  { %v856_v21 = vsub.f32 1.5, %v855_v20  ;;  %v1035_v20 = vld [vmem:[%s2504_s25 + $0x20] sm:$0xff] }
 0x8f6   :  { %v857_v22 = vmul.f32 %v1772_v17, %v856_v21  ;;  %v1702_v21 = vld [vmem:[%s2504_s25 + $0x40] sm:$0xff] }
 0x8f8   :  { %v861_v25 = vsel %vm860_vm0, %v1772_v17, %v857_v22  ;;  %v1036_v17 = vld [vmem:[%s2504_s25 + $0x28] sm:$0xff]  ;;  %v1034_v22 = vld [vmem:[%s2504_s25 + $0x18] sm:$0xff] }
 0x8f9   :  { %v862_v28 = vmul.f32 %v861_v25, %v2247_v33  ;;  %v1033_v25 = vld [vmem:[%s2504_s25 + $0x10] sm:$0xff] }
 0x8fb   :  { %v866_v29 = vmul.f32 %v1751_v23, %v862_v28  ;;  %v1701_v23 = vld [vmem:[%s2504_s25 + $0x38] sm:$0xff]  ;;  %v1031_v28 = vld [vmem:[%s2504_s25] sm:$0xff] }
 0x8fd   :  { %v2299_v30 = vadd.f32 %v1752_v26, %v866_v29  ;;  %v1032_v26 = vld [vmem:[%s2504_s25 + $0x8] sm:$0xff] }
 0x8ff   :  { %1652 = vmatmul.msk.f32.vlgmr.msrb.gmra.mxu2 %vm201_vm7, %v2299_v30  ;;  %1653 = vmatmul.msk.f32.vlgmr.msra.gmra.mxu3 %vm201_vm7, %v2299_v30 }
 0x900   :  { %1654 = vmatmul.msk.f32.vlgmr.msra.gmra.mxu0 %vm201_vm7, %v2299_v30 }
 0x907   :  { %1683 = vmatmul.msk.f32.vlgmr.msrb.gmra.mxu3 %vm201_vm7, %v2299_v30 }
 0x97d   :  { %v967_v31 = vpop.f32.mrf.mxu0 }
 0x97e   :  { %1026 = vmatpush.msra.mxu1 %v967_v31 }
 0x980   :  { %1120 = vmatpush.msrb.mxu1 %v1695_v54  ;;  %v1317_v54 = vld [vmem:[%s2506_s3 + $0xe8] sm:$0xff] }
 0x982   :  { %v935_v33 = vpop.f32.mrf.mxu3  ;;  %v903_v35 = vpop.f32.mrf.mxu2  ;;  %1121 = vmatpush.msrb.mxu1 %v1694_v55  ;;  %v1312_v55 = vld [vmem:[%s2506_s3 + $0xc0] sm:$0xff] }
 0x983   :  { %1655 = vmatpush.xpose.msk.msra.mxu2 %vm289_vm8, %v935_v33  ;;  %v1700_v33 = vld [vmem:[%s2504_s25 + $0x30] sm:$0xff] }
 0x984   :  { %1122 = vmatpush.msrb.mxu1 %v1693_v56  ;;  %v1313_v56 = vld [vmem:[%s2506_s3 + $0xc8] sm:$0xff] }
 0x986   :  { %1656 = vmatmul.msk.f32.vlgmr.msra.gmra.mxu2 %vm289_vm8, %v903_v35  ;;  %1123 = vmatpush.msrb.mxu1 %v1692_v61  ;;  %v1753_v35 = vld [vmem:[%s2505_s29] ss:$0 sm:$0xff]  ;;  %v1307_v61 = vld [vmem:[%s2506_s3 + $0x98] sm:$0xff] }
 0x987   :  { %1054 = vmatpush.msrb.mxu2 %v1669_v32 }
 0x988   :  { %1124 = vmatpush.msrb.mxu1 %v1691_v62  ;;  %v1308_v62 = vld [vmem:[%s2506_s3 + $0xa0] sm:$0xff] }
 0x989   :  { %1055 = vmatpush.msrb.mxu2 %v1668_v34 }
 0x98a   :  { %v1100_v46 = vpop.f32.mrf.mxu3  ;;  %1125 = vmatpush.msrb.mxu1 %v1690_v63  ;;  %v1303_v63 = vld [vmem:[%s2506_s3 + $0x78] sm:$0xff] }
 0x98b   :  { %1056 = vmatpush.msrb.mxu2 %v1667_v36 }
 0x98c   :  { %1126 = vmatpush.msrb.mxu1 %v1689_v0  ;;  %v1304_v0 = vld [vmem:[%s2506_s3 + $0x80] sm:$0xff] }
 0x98d   :  { %1057 = vmatpush.msrb.mxu2 %v1666_v37 }
 0x98e   :  { %1127 = vmatpush.msrb.mxu1 %v1688_v1  ;;  %v1305_v1 = vld [vmem:[%s2506_s3 + $0x88] sm:$0xff] }
 0x98f   :  { %1058 = vmatpush.msrb.mxu2 %v1665_v38 }
 0x990   :  { %1128 = vmatpush.msrb.mxu1 %v1687_v2  ;;  %v1300_v2 = vld [vmem:[%s2506_s3 + $0x60] sm:$0xff] }
 0x991   :  { %1059 = vmatpush.msrb.mxu2 %v1664_v39 }
 0x992   :  { %1129 = vmatpush.msrb.mxu1 %v1686_v3  ;;  %v1301_v3 = vld [vmem:[%s2506_s3 + $0x68] sm:$0xff] }
 0x993   :  { %1060 = vmatpush.msrb.mxu2 %v1663_v40 }
 0x994   :  { %1130 = vmatpush.msrb.mxu1 %v1685_v4  ;;  %v1302_v4 = vld [vmem:[%s2506_s3 + $0x70] sm:$0xff] }
 0x995   :  { %1061 = vmatpush.msrb.mxu2 %v1662_v41 }
 0x996   :  { %1131 = vmatpush.msrb.mxu1 %v1684_v5  ;;  %v1297_v5 = vld [vmem:[%s2506_s3 + $0x48] sm:$0xff] }
 0x997   :  { %1062 = vmatpush.msrb.mxu2 %v1661_v42 }
 0x999   :  { %1063 = vmatpush.msrb.mxu2 %v1660_v43 }
 0x99b   :  { %1064 = vmatpush.msrb.mxu2 %v1659_v44 }
 0x99d   :  { %1065 = vmatpush.msrb.mxu2 %v1658_v45 }
 0x99e   :  { %1670 = vmatmul.msk.f32.vlgmr.msrb.gmra.mxu2 %vm201_vm7, %v2299_v30 }
 0x99f   :  { %1697 = vmatpush.xpose.msk.msra.mxu2 %vm289_vm8, %v1100_v46 }
 0x9a3   :  { %1217 = vmatpush.msrb.mxu2 %v1705_v15  ;;  %v1289_v15 = vld [vmem:[%s2506_s3 + $0x8] sm:$0xff] }
 0x9a5   :  { %1218 = vmatpush.msrb.mxu2 %v1704_v16  ;;  %v1290_v16 = vld [vmem:[%s2506_s3 + $0x10] sm:$0xff] }
 0x9a7   :  { %1219 = vmatpush.msrb.mxu2 %v1703_v18  ;;  %v1429_v18 = vld [vmem:[%s2507_s8 + $0xf8] sm:$0xff] }
 0x9a9   :  { %1220 = vmatpush.msrb.mxu2 %v1702_v21 }
 0x9ab   :  { %1221 = vmatpush.msrb.mxu2 %v1701_v23  ;;  %v1427_v23 = vld [vmem:[%s2507_s8 + $0xe8] sm:$0xff] }
 0x9ad   :  { %1222 = vmatpush.msrb.mxu2 %v1700_v33  ;;  %v1443_v33 = vld [vmem:[%s2507_s8 + $0x168] sm:$0xff] }
 0xa09   :  { %v993_v47 = vpop.f32.mrf.mxu2 }
 0xa0a   :  { %v996_v48 = vmul.f32 0.10206208, %v993_v47  ;;  %v1322_v47 = vld [vmem:[%s2506_s3 + $0x110] sm:$0xff] }
 0xa0b   :  { %1359 = vmatpush.msrb.mxu0 %v1322_v47 }
 0xa0c   :  { %v997_v49 = vsel %vm317_vm9, %v996_v48, -inf }
 0xa0d   :  { %998 = vmax.xlane.f32.xlu2 %v997_v49  ;;  %v1318_v49 = vld [vmem:[%s2506_s3 + $0xf0] sm:$0xff] }
 0xa21   :  { %v1067_v50 = vpop.f32.mrf.mxu2 }
 0xa22   :  { %1698 = vmatmul.msk.f32.vlgmr.msra.gmra.mxu2 %vm289_vm8, %v1067_v50  ;;  %v1319_v50 = vld [vmem:[%s2506_s3 + $0xf8] sm:$0xff] }
 0xa23   :  { %1360 = vmatpush.msrb.mxu0 %v1319_v50  ;;  %v1438_v50 = vld [vmem:[%s2507_s8 + $0x140] sm:$0xff] }
 0xa80   :  { %v999_v51 = vpop.xlane.xlu2 %998 }
 0xa81   :  { %v1000_v52 = vsub.f32 %v996_v48, %v999_v51  ;;  %v1323_v48 = vld [vmem:[%s2506_s3 + $0x118] sm:$0xff]  ;;  %v1320_v51 = vld [vmem:[%s2506_s3 + $0x100] sm:$0xff] }
 0xa82   :  { %1379 = vmatpush.msra.mxu2 %v1323_v48  ;;  %v1405_v48 = vld [vmem:[%s2507_s8 + $0x38] sm:$0xff] }
 0xa83   :  { %v1001_v53 = vmul.f32 1.442695, %v1000_v52  ;;  %v1315_v52 = vld [vmem:[%s2506_s3 + $0xd8] sm:$0xff] }
 0xa84   :  { %1380 = vmatpush.msra.mxu2 %v1320_v51 }
 0xa85   :  { %1773 = vpow2.f32 %v1001_v53  ;;  %v1316_v53 = vld [vmem:[%s2506_s3 + $0xe0] sm:$0xff] }
 0xa86   :  { %1361 = vmatpush.msrb.mxu0 %v1316_v53  ;;  %1381 = vmatpush.msra.mxu2 %v1317_v54  ;;  %v1420_v53 = vld [vmem:[%s2507_s8 + $0xb0] sm:$0xff]  ;;  %v1437_v54 = vld [vmem:[%s2507_s8 + $0x138] sm:$0xff] }
 0xa88   :  { %1362 = vmatpush.msrb.mxu0 %v1313_v56  ;;  %v1403_v56 = vld [vmem:[%s2507_s8 + $0x28] sm:$0xff] }
 0xa8b   :  { %v1774_v57 = vpop.eup %1773 }
 0xa8c   :  { %v1003_v27 = vsel %vm317_vm9, %v1774_v57, 0.0 }
 0xa8d   :  { %1004 = vadd.xlane.f32.xlu1 %v1003_v27  ;;  %v1309_v27 = vld [vmem:[%s2506_s3 + $0xa8] sm:$0xff] }
 0xaa5   :  { %v1159_v58 = vpop.f32.mrf.mxu2 }
 0xaa6   :  { %v1162_v59 = vmul.f32 0.10206208, %v1159_v58  ;;  %v1310_v58 = vld [vmem:[%s2506_s3 + $0xb0] sm:$0xff] }
 0xaa7   :  { %1363 = vmatpush.msrb.mxu0 %v1310_v58 }
 0xaa8   :  { %v1163_v60 = vsel %vm317_vm9, %v1162_v59, -inf }
 0xaa9   :  { %1164 = vmax.xlane.f32.xlu2 %v1163_v60  ;;  %v1306_v60 = vld [vmem:[%s2506_s3 + $0x90] sm:$0xff]  ;;  %1364 = vmatpush.msrb.mxu0 %v1307_v61 }
 0xaab   :  { %1365 = vmatpush.msrb.mxu0 %v1304_v0  ;;  %v1754_v0 = vld [vmem:[%s2508_s14] ss:$0 sm:$0xff] }
 0xaad   :  { %1366 = vmatpush.msrb.mxu0 %v1301_v3  ;;  %v1755_v3 = vld [vmem:[%s2509_s19] ss:$0 sm:$0xff] }
 0xb00   :  { %v1005_v6 = vpop.xlane.xlu1 %1004 }
 0xb01   :  { %1775 = vrcp.f32 %v1005_v6  ;;  %v1298_v6 = vld [vmem:[%s2506_s3 + $0x50] sm:$0xff] }
 0xb02   :  { %1367 = vmatpush.msrb.mxu0 %v1298_v6  ;;  %v1400_v6 = vld [vmem:[%s2507_s8 + $0x10] sm:$0xff] }
 0xb07   :  { %v1776_v7 = vpop.eup %1775 }
 0xb08   :  { %v1007_v8 = vmul.f32 %v1776_v7, %v1774_v57  ;;  %v1314_v57 = vld [vmem:[%s2506_s3 + $0xd0] sm:$0xff]  ;;  %v1299_v7 = vld [vmem:[%s2506_s3 + $0x58] sm:$0xff] }
 0xb09   :  { %1382 = vmatpush.msra.mxu2 %v1314_v57  ;;  %v1419_v57 = vld [vmem:[%s2507_s8 + $0xa8] sm:$0xff] }
 0xb0a   :  { %1657 = vmatmul.msk.f32.vlgmr.msra.gmra.mxu1 %vm317_vm9, %v1007_v8  ;;  %v1294_v8 = vld [vmem:[%s2506_s3 + $0x30] sm:$0xff] }
 0xb12   :  { %1696 = vmatmul.msk.f32.vlgmr.msrb.gmra.mxu1 %vm201_vm7, %v2299_v30 }
 0xb1c   :  { %v1165_v9 = vpop.xlane.xlu2 %1164 }
 0xb1d   :  { %v1166_v10 = vsub.f32 %v1162_v59, %v1165_v9  ;;  %v1311_v59 = vld [vmem:[%s2506_s3 + $0xb8] sm:$0xff] }
 0xb1e   :  { %1383 = vmatpush.msra.mxu2 %v1311_v59  ;;  %v1295_v9 = vld [vmem:[%s2506_s3 + $0x38] sm:$0xff]  ;;  %v1402_v59 = vld [vmem:[%s2507_s8 + $0x20] sm:$0xff] }
 0xb1f   :  { %v1167_v11 = vmul.f32 1.442695, %v1166_v10  ;;  %v1296_v10 = vld [vmem:[%s2506_s3 + $0x40] sm:$0xff]  ;;  %1368 = vmatpush.msrb.mxu0 %v1295_v9  ;;  %v1415_v9 = vld [vmem:[%s2507_s8 + $0x88] sm:$0xff] }
 0xb20   :  { %1384 = vmatpush.msra.mxu2 %v1308_v62  ;;  %v1401_v62 = vld [vmem:[%s2507_s8 + $0x18] sm:$0xff] }
 0xb21   :  { %1777 = vpow2.f32 %v1167_v11  ;;  %v1291_v11 = vld [vmem:[%s2506_s3 + $0x18] sm:$0xff] }
 0xb22   :  { %1385 = vmatpush.msra.mxu2 %v1305_v1 }
 0xb24   :  { %1386 = vmatpush.msra.mxu2 %v1302_v4 }
 0xb26   :  { %1387 = vmatpush.msra.mxu2 %v1299_v7  ;;  %v1416_v7 = vld [vmem:[%s2507_s8 + $0x90] sm:$0xff] }
 0xb27   :  { %v1778_v12 = vpop.eup %1777 }
 0xb28   :  { %v1169_v13 = vsel %vm317_vm9, %v1778_v12, 0.0  ;;  %1388 = vmatpush.msra.mxu2 %v1296_v10  ;;  %v1434_v10 = vld [vmem:[%s2507_s8 + $0x120] sm:$0xff] }
 0xb29   :  { %1170 = vadd.xlane.f32.xlu0 %v1169_v13  ;;  %v1293_v13 = vld [vmem:[%s2506_s3 + $0x28] sm:$0xff] }
 0xb2a   :  { %1389 = vmatpush.msra.mxu2 %v1293_v13  ;;  %v1433_v13 = vld [vmem:[%s2507_s8 + $0x118] sm:$0xff] }
 0xb2c   :  { %1390 = vmatpush.msra.mxu2 %v1290_v16  ;;  %v1430_v16 = vld [vmem:[%s2507_s8 + $0x100] sm:$0xff] }
 0xb87   :  { %v1028_v14 = vpop.f32.mrf.mxu1 }
 0xb8f   :  { %v1133_v19 = vpop.f32.mrf.mxu1 }
 0xb90   :  { %1192 = vmatpush.msra.mxu3 %v1133_v19  ;;  %v1412_v19 = vld [vmem:[%s2507_s8 + $0x70] sm:$0xff] }
 0xb92   :  { %1240 = vmatpush.msrb.mxu3 %v1036_v17  ;;  %v1413_v17 = vld [vmem:[%s2507_s8 + $0x78] sm:$0xff] }
 0xb94   :  { %1241 = vmatpush.msrb.mxu3 %v1035_v20  ;;  %v1428_v20 = vld [vmem:[%s2507_s8 + $0xf0] sm:$0xff] }
 0xb96   :  { %1242 = vmatpush.msrb.mxu3 %v1034_v22  ;;  %v1411_v22 = vld [vmem:[%s2507_s8 + $0x68] sm:$0xff] }
 0xb98   :  { %1243 = vmatpush.msrb.mxu3 %v1033_v25  ;;  %v1445_v25 = vld [vmem:[%s2507_s8 + $0x178] sm:$0xff] }
 0xb9a   :  { %1244 = vmatpush.msrb.mxu3 %v1032_v26 }
 0xb9c   :  { %v1171_v29 = vpop.xlane.xlu0 %1170  ;;  %1245 = vmatpush.msrb.mxu3 %v1031_v28  ;;  %v1444_v28 = vld [vmem:[%s2507_s8 + $0x170] sm:$0xff] }
 0xb9d   :  { %1779 = vrcp.f32 %v1171_v29  ;;  %v1410_v29 = vld [vmem:[%s2507_s8 + $0x60] sm:$0xff] }
 0xba3   :  { %v1780_v31 = vpop.eup %1779 }
 0xba4   :  { %v1173_v32 = vmul.f32 %v1780_v31, %v1778_v12  ;;  %v1292_v12 = vld [vmem:[%s2506_s3 + $0x20] sm:$0xff] }
 0xba5   :  { %1369 = vmatpush.msrb.mxu0 %v1292_v12  ;;  %v1426_v31 = vld [vmem:[%s2507_s8 + $0xe0] sm:$0xff] }
 0xba6   :  { %1699 = vmatmul.msk.f32.vlgmr.msra.gmra.mxu3 %vm317_vm9, %v1173_v32  ;;  %v1414_v12 = vld [vmem:[%s2507_s8 + $0x80] sm:$0xff] }
 0xba7   :  { %1370 = vmatpush.msrb.mxu0 %v1289_v15  ;;  %1450 = vmatpush.msra.mxu3 %v1413_v17  ;;  %v1431_v15 = vld [vmem:[%s2507_s8 + $0x108] sm:$0xff]  ;;  %v1324_v17 = vld [vmem:[%s2510_s24] sm:$0x7] }
 0xba9   :  { %1451 = vmatpush.msra.mxu3 %v1412_v19  ;;  %1490 = vmatpush.msra.mxu0 %v1445_v25  ;;  %v1327_v19 = vperm.slane %v1324_v17, 1 }
 0xbab   :  { %1452 = vmatpush.msra.mxu3 %v1411_v22  ;;  %1491 = vmatpush.msra.mxu0 %v1444_v28  ;;  %v1328_v28 = vperm.slane %v1324_v17, 2 }
 0xbad   :  { %1453 = vmatpush.msra.mxu3 %v1410_v29  ;;  %1492 = vmatpush.msra.mxu0 %v1443_v33  ;;  %v1756_v33 = vld [vmem:[%s1988_s20] ss:$0 sm:$0xff]  ;;  %s1551_s20 = sshll.u32 %s2003_s12, 4  ;;  %s1552_s20 = int_to_ptr.hbm [resolvable:$true] %s1551_s20 }
 0xbae   :  { %1707 = vmatmul.msk.f32.vlgmr.msrb.gmra.mxu3 %vm289_vm8, %v1028_v14  ;;  %v1288_v14 = vld [vmem:[%s2506_s3] sm:$0xff]  ;;  %s1797_s15 = sshra.s32 %s1552_s20, 4  ;;  %s1798_s15 = int_to_ptr.hbm [resolvable:$true] %s1797_s15 }
 0xbaf   :  { %s1799_s16 = scalar_lea.hbm %s1798_s15, 8  ;;  %p1802_p1 = scmp.lt.s32.totalorder %s1798_s15, %s2003_s12 }
 0xbb0   :  { %p1800_p0 = scmp.ne.s32.totalorder %s1798_s15, %s1799_s16  ;;  %p1803_p2 = scmp.lt.s32.totalorder %s1801_s18, %s1799_s16 }
 0xbb2   :  { %p1804_p3 = por %p1803_p2, %p1802_p1 }
 0xbb4   :  { %p1805_p4 = pnand %p1804_p3, %p1800_p0 }
 0xc29   :  { %v1194_v34 = vpop.f32.mrf.mxu3 }
 0xc2a   :  { %1706 = vmatmul.msk.f32.vlgmr.msrb.gmra.mxu2 %vm289_vm8, %v1194_v34  ;;  %v1409_v34 = vld [vmem:[%s2507_s8 + $0x58] sm:$0xff] }
 0xc2b   :  { %1454 = vmatpush.msra.mxu3 %v1409_v34 }
 0xc31   :  { %v1247_v36 = vpop.f32.mrf.mxu3 }
 0xcad   :  { %v1224_v37 = vpop.f32.mrf.mxu2 }
 0xcae   :  { %v1248_v38 = vadd.f32 %v1247_v36, %v1224_v37  ;;  %v1442_v36 = vld [vmem:[%s2507_s8 + $0x160] sm:$0xff]  ;;  %v1408_v37 = vld [vmem:[%s2507_s8 + $0x50] sm:$0xff] }
 0xcaf   :  { %1493 = vmatpush.msra.mxu0 %v1442_v36  ;;  %1455 = vmatpush.msra.mxu3 %v1408_v37 }
 0xcb0   :  { %v1254_v39 = vadd.f32 %v1753_v35, %v1248_v38  ;;  %v1425_v35 = vld [vmem:[%s2507_s8 + $0xd8] sm:$0xff]  ;;  %v1424_v38 = vld [vmem:[%s2507_s8 + $0xd0] sm:$0xff] }
 0xcb2   :  { %v1255_v40 = vadd.f32 %v1254_v39, %v2299_v30  ;;  %v1321_v30 = vld [vmem:[%s2506_s3 + $0x108] sm:$0xff]  ;;  %v1441_v39 = vld [vmem:[%s2507_s8 + $0x158] sm:$0xff] }
 0xcb3   :  { %1339 = vmatpush.msra.mxu1 %v1321_v30  ;;  %1494 = vmatpush.msra.mxu0 %v1441_v39  ;;  %v1439_v30 = vld [vmem:[%s2507_s8 + $0x148] sm:$0xff] }
 0xcb4   :  { %v1258_v41 = vsel %vm201_vm7, %v1255_v40, 0.0 }
 0xcb5   :  { %1259 = vadd.xlane.f32.xlu1 %v1258_v41  ;;  %1340 = vmatpush.msra.mxu1 %v1318_v49  ;;  %v1423_v41 = vld [vmem:[%s2507_s8 + $0xc8] sm:$0xff]  ;;  %v1421_v49 = vld [vmem:[%s2507_s8 + $0xb8] sm:$0xff] }
 0xcb7   :  { %1341 = vmatpush.msra.mxu1 %v1315_v52  ;;  %v1404_v52 = vld [vmem:[%s2507_s8 + $0x30] sm:$0xff] }
 0xcb9   :  { %1342 = vmatpush.msra.mxu1 %v1312_v55 }
 0xcbb   :  { %1343 = vmatpush.msra.mxu1 %v1309_v27  ;;  %v1436_v27 = vld [vmem:[%s2507_s8 + $0x130] sm:$0xff] }
 0xcbd   :  { %1344 = vmatpush.msra.mxu1 %v1306_v60  ;;  %v1418_v60 = vld [vmem:[%s2507_s8 + $0xa0] sm:$0xff] }
 0xcbf   :  { %1345 = vmatpush.msra.mxu1 %v1303_v63  ;;  %v1417_v63 = vld [vmem:[%s2507_s8 + $0x98] sm:$0xff] }
 0xcc1   :  { %1346 = vmatpush.msra.mxu1 %v1300_v2 }
 0xcc3   :  { %1347 = vmatpush.msra.mxu1 %v1297_v5 }
 0xcc5   :  { %1348 = vmatpush.msra.mxu1 %v1294_v8  ;;  %v1435_v8 = vld [vmem:[%s2507_s8 + $0x128] sm:$0xff] }
 0xcc7   :  { %1349 = vmatpush.msra.mxu1 %v1291_v11  ;;  %v1398_v11 = vld [vmem:[%s2507_s8] sm:$0xff] }
 0xcc9   :  { %1350 = vmatpush.msra.mxu1 %v1288_v14  ;;  %v1432_v14 = vld [vmem:[%s2507_s8 + $0x110] sm:$0xff] }
 0xccb   :  { %1470 = vmatpush.msrb.mxu1 %v1429_v18  ;;  %v1326_v18 = vperm.slane %v1324_v17, 0 }
 0xccd   :  { %1471 = vmatpush.msrb.mxu1 %v1428_v20 }
 0xccf   :  { %1472 = vmatpush.msrb.mxu1 %v1427_v23 }
 0xcd1   :  { %1473 = vmatpush.msrb.mxu1 %v1426_v31 }
 0xcd3   :  { %1474 = vmatpush.msrb.mxu1 %v1425_v35 }
 0xcd5   :  { %1475 = vmatpush.msrb.mxu1 %v1424_v38 }
 0xcd7   :  { %1476 = vmatpush.msrb.mxu1 %v1423_v41 }
 0xd28   :  { %v1260_v42 = vpop.xlane.xlu1 %1259 }
 0xd29   :  { %v1261_v43 = vmul.f32 %v1260_v42, %v2134_v24  ;;  %v1440_v42 = vld [vmem:[%s2507_s8 + $0x150] sm:$0xff] }
 0xd2a   :  { %1495 = vmatpush.msra.mxu0 %v1440_v42 }
 0xd2b   :  { %v2365_v44 = vsub.f32 %v1255_v40, %v1261_v43  ;;  %v1407_v40 = vld [vmem:[%s2507_s8 + $0x48] sm:$0xff]  ;;  %v1406_v43 = vld [vmem:[%s2507_s8 + $0x40] sm:$0xff] }
 0xd2c   :  { %1456 = vmatpush.msra.mxu3 %v1407_v40  ;;  %1496 = vmatpush.msra.mxu0 %v1439_v30 }
 0xd2d   :  { %v1263_v45 = vmul.f32 %v2365_v44, %v2365_v44 }
 0xd2e   :  { %1457 = vmatpush.msra.mxu3 %v1406_v43  ;;  %1497 = vmatpush.msra.mxu0 %v1438_v50 }
 0xd2f   :  { %v1264_v46 = vsel %vm201_vm7, %v1263_v45, 0.0  ;;  %v1422_v45 = vld [vmem:[%s2507_s8 + $0xc0] sm:$0xff] }
 0xd30   :  { %1265 = vadd.xlane.f32.xlu2 %v1264_v46  ;;  %1477 = vmatpush.msrb.mxu1 %v1422_v45 }
 0xd31   :  { %1458 = vmatpush.msra.mxu3 %v1405_v48  ;;  %1498 = vmatpush.msra.mxu0 %v1437_v54 }
 0xd32   :  { %1478 = vmatpush.msrb.mxu1 %v1421_v49 }
 0xd33   :  { %1459 = vmatpush.msra.mxu3 %v1404_v52  ;;  %1499 = vmatpush.msra.mxu0 %v1436_v27 }
 0xd34   :  { %1479 = vmatpush.msrb.mxu1 %v1420_v53 }
 0xd35   :  { %1460 = vmatpush.msra.mxu3 %v1403_v56  ;;  %1500 = vmatpush.msra.mxu0 %v1435_v8  ;;  %v1757_v56 = vld [vmem:[%s1993_s27] ss:$0 sm:$0xff] }
 0xd36   :  { %1480 = vmatpush.msrb.mxu1 %v1419_v57 }
 0xd37   :  { %1461 = vmatpush.msra.mxu3 %v1402_v59  ;;  %1501 = vmatpush.msra.mxu0 %v1434_v10 }
 0xd38   :  { %1481 = vmatpush.msrb.mxu1 %v1418_v60 }
 0xd39   :  { %1462 = vmatpush.msra.mxu3 %v1401_v62  ;;  %1502 = vmatpush.msra.mxu0 %v1433_v13 }
 0xd3a   :  { %1482 = vmatpush.msrb.mxu1 %v1417_v63 }
 0xd3b   :  { %1463 = vmatpush.msra.mxu3 %v1400_v6  ;;  %1503 = vmatpush.msra.mxu0 %v1432_v14 }
 0xd3c   :  { %1483 = vmatpush.msrb.mxu1 %v1416_v7 }
 0xd3d   :  { %1504 = vmatpush.msra.mxu0 %v1431_v15 }
 0xd3e   :  { %1484 = vmatpush.msrb.mxu1 %v1415_v9 }
 0xd3f   :  { %1505 = vmatpush.msra.mxu0 %v1430_v16 }
 0xd40   :  { %1485 = vmatpush.msrb.mxu1 %v1414_v12 }
 0xda3   :  { %v1266_v21 = vpop.xlane.xlu2 %1265 }
 0xda4   :  { %v1267_v26 = vmul.f32 %v1266_v21, %v2134_v24 }
 0xda6   :  { %v2417_v32 = vadd.f32 1e-05, %v1267_v26 }
 0xda8   :  { %1781 = vrsqrt.f32 %v2417_v32  ;;  %vm1275_vm2 = vweird.f32 %v2417_v32 }
 0xdae   :  { %v1782_v46 = vpop.eup %1781 }
 0xdaf   :  { %v1270_v47 = vmul.f32 %v1782_v46, %v2417_v32  ;;  %vm1276_vm1 = vweird.f32 %v1782_v46 }
 0xdb0   :  { %vm1277_vm3 = vmor %vm1275_vm2, %vm1276_vm1 }
 0xdb1   :  { %v1271_v51 = vmul.f32 %v1782_v46, %v1270_v47 }
 0xdb3   :  { %v1272_v55 = vmul.f32 0.5, %v1271_v51 }
 0xdb5   :  { %v1273_v58 = vsub.f32 1.5, %v1272_v55 }
 0xdb7   :  { %v1274_v61 = vmul.f32 %v1782_v46, %v1273_v58  ;;  %v1758_v58 = vld [vmem:[%s1998_s4] ss:$0 sm:$0xff] }
 0xdb9   :  { %v1278_v1 = vsel %vm1277_vm3, %v1782_v46, %v1274_v61 }
 0xdba   :  { %v1279_v2 = vmul.f32 %v1278_v1, %v2365_v44  ;;  %v1399_v44 = vld [vmem:[%s2507_s8 + $0x8] sm:$0xff] }
 0xdbb   :  { %1464 = vmatpush.msra.mxu3 %v1399_v44 }
 0xdbc   :  { %v1283_v4 = vmul.f32 %v1754_v0, %v1279_v2 }
 0xdbd   :  { %1465 = vmatpush.msra.mxu3 %v1398_v11 }
 0xdbe   :  { %v1287_v5 = vadd.f32 %v1755_v3, %v1283_v4 }
 0xdc0   :  { %1708 = vmatmul.msk.f32.vlgmr.msra.gmra.mxu1 %vm201_vm7, %v1287_v5  ;;  %1709 = vmatmul.msk.f32.vlgmr.msrb.gmra.mxu0 %vm201_vm7, %v1287_v5 }
 0xdc1   :  { %1710 = vmatmul.msk.f32.vlgmr.msra.gmra.mxu2 %vm201_vm7, %v1287_v5 }
 0xe3d   :  { %v1352_v20 = vpop.f32.mrf.mxu1  ;;  %v1372_v21 = vpop.f32.mrf.mxu0 }
 0xe3e   :  { %v1353_v22 = vadd.f32 %v1352_v20, %v1326_v18  ;;  %v1373_v23 = vadd.f32 %v1372_v21, %v1327_v19 }
 0xe40   :  { %v1395_v25 = vmax.f32 %v1353_v22, 0.0  ;;  %v1396_v26 = vmax.f32 %v1373_v23, 0.0 }
 0xe42   :  { %1466 = vmatmul.f32.vlgmr.msra.gmra.mxu3 %v1395_v25  ;;  %1486 = vmatmul.f32.vlgmr.msrb.gmra.mxu1 %v1396_v26 }
 0xe44   :  { %v1392_v29 = vpop.f32.mrf.mxu2 }
 0xe45   :  { %v1393_v31 = vadd.f32 %v1392_v29, %v1328_v28 }
 0xe47   :  { %v1397_v32 = vmax.f32 %v1393_v31, 0.0 }
 0xe49   :  { %1506 = vmatmul.f32.vlgmr.msra.gmra.mxu0 %v1397_v32 }
 0xebf   :  { %v1487_v36 = vpop.f32.mrf.mxu1 }
 0xec5   :  { %v1467_v34 = vpop.f32.mrf.mxu3 }
 0xec6   :  { %v1468_v35 = vadd.f32 %v1756_v33, %v1467_v34  ;;  %v1507_v38 = vpop.f32.mrf.mxu0 }
 0xec8   :  { %v1488_v37 = vadd.f32 %v1487_v36, %v1468_v35 }
 0xeca   :  { %v1508_v39 = vadd.f32 %v1507_v38, %v1488_v37 }
 0xecc   :  { %v1510_v40 = vadd.f32 %v1508_v39, %v1287_v5 }
 0xece   :  { %v1513_v41 = vsel %vm201_vm7, %v1510_v40, 0.0 }
 0xecf   :  { %1514 = vadd.xlane.f32.xlu0 %v1513_v41 }
 0xf42   :  { %v1515_v42 = vpop.xlane.xlu0 %1514 }
 0xf43   :  { %v1516_v43 = vmul.f32 %v1515_v42, %v2134_v24 }
 0xf45   :  { %v1517_v45 = vsub.f32 %v1510_v40, %v1516_v43 }
 0xf47   :  { %v1518_v46 = vmul.f32 %v1517_v45, %v1517_v45 }
 0xf49   :  { %v1519_v30 = vsel %vm201_vm7, %v1518_v46, 0.0 }
 0xf4a   :  { %1520 = vadd.xlane.f32.xlu1 %v1519_v30 }
 0xfbd   :  { %v1521_v47 = vpop.xlane.xlu1 %1520 }
 0xfbe   :  { %v1522_v48 = vmul.f32 %v1521_v47, %v2134_v24 }
 0xfc0   :  { %v1523_v49 = vadd.f32 1e-05, %v1522_v48 }
 0xfc2   :  { %1783 = vrsqrt.f32 %v1523_v49  ;;  %vm1530_vm5 = vweird.f32 %v1523_v49 }
 0xfc8   :  { %v1784_v50 = vpop.eup %1783 }
 0xfc9   :  { %v1525_v51 = vmul.f32 %v1784_v50, %v1523_v49  ;;  %vm1531_vm4 = vweird.f32 %v1784_v50 }
 0xfca   :  { %vm1532_vm6 = vmor %vm1530_vm5, %vm1531_vm4 }
 0xfcb   :  { %v1526_v52 = vmul.f32 %v1784_v50, %v1525_v51 }
 0xfcd   :  { %v1527_v53 = vmul.f32 0.5, %v1526_v52 }
 0xfcf   :  { %v1528_v54 = vsub.f32 1.5, %v1527_v53 }
 0xfd1   :  { %v1529_v55 = vmul.f32 %v1784_v50, %v1528_v54 }
 0xfd3   :  { %v1533_v57 = vsel %vm1532_vm6, %v1784_v50, %v1529_v55 }
 0xfd4   :  { %v1534_v27 = vmul.f32 %v1533_v57, %v1517_v45 }
 0xfd6   :  { %v1538_v24 = vmul.f32 %v1757_v56, %v1534_v27 }
 0xfd8   :  { %v1542_v59 = vadd.f32 %v1758_v58, %v1538_v24 }
 0xfda   :  { %1543 = vst.msk [vmem:[#allocation2] sm:$0xff] %vm201_vm7, %v1542_v59 }
 0xfdb   :  { %1808 = shalt.err (!%p1805_p4)
}
 0xfdc   :  { %1554 = dma.vmem_to_hbm [thread:$0]  %s1550_s6, 128, %s1552_s20, [#allocation3]  }
 0xfdd   :  { %1809 = dma.done.wait [#allocation3], 128  }
 0xfde   :  { %1810 = vsyncadd [#allocation3], 4294967168 }
 0xfdf   :  { %1559 = vsyncpa [#allocation3], 1 }

</bundles_post_ra>
